<compile_context>
chip_gen: v5e
topology: v5e:2x2
jax: 0.10.0
libtpu: 0.0.40
codegen_flags: <defaults>
</compile_context>

<pallas_src>
import functools

import jax
import jax.numpy as jnp
from jax.experimental import pallas as pl
from jax.experimental.pallas import tpu as pltpu

LAYERS = 3
NEG_SLOPE = 0.2        # GATConv default negative_slope
NORM_EPS = 1e-5        # pyg LayerNorm default eps
SOFTMAX_EPS = 1e-16    # pyg softmax denominator eps

C_PAD = 128            # lane-dense channel width
H_PAD = 128            # lane-dense MLP hidden width


def gnn_kernel(seg_ref, src_ref, ae_ref, x0_ref,
               w_ref, bias_ref, norm_w_ref, norm_b_ref,
               mlp_w1_ref, mlp_b1_ref, mlp_w2_ref, mlp_b2_ref,
               out_ref,
               xp_ref, agg_ref,
               *, layers, c_real, n_edges):
    n_nodes, c_pad = agg_ref.shape
    col_src = c_real           # column of xp holding  <lin(x), att_src>
    col_dst = c_real + 1       # column of xp holding  <lin(x), att_dst>

    x = x0_ref[...]                                   # (N, CP); cols >= c_real are 0

    # ---- loop-invariant hoists (JAX does not CSE broadcasts) -----------------
    norm_w = norm_w_ref[...]                          # (1, CP)
    norm_b = norm_b_ref[...]                          # (1, CP)
    col_mask = (jax.lax.broadcasted_iota(jnp.int32, (1, c_pad), 1)
                < c_real).astype(jnp.float32)         # (1, CP) real-channel mask
    inv_cnt = 1.0 / (n_nodes * c_real)                # static python float

    for i in range(layers):                           # static unroll over layers
        xl = x
        layer_off = i * n_edges                       # static offset into ae table

        # ---- dense phase: lin(x) + both attention projections, ONE MXU matmul --
        xp_ref[...] = jnp.dot(x, w_ref[i], preferred_element_type=jnp.float32)

        # ---- edge/aggregation phase -------------------------------------------
        # edges are pre-sorted by destination; each node's incoming segment is
        # [seg[d], seg[d+1]).  Per-segment max / denominator / weighted sum are
        # accumulated in registers and written back once per node.
        def node_body(d, carry):
            start = seg_ref[d]
            end = seg_ref[d + 1]
            adst_d = xp_ref[pl.ds(d, 1), col_dst:col_dst + 1]        # (1,1)

            def edge_logit(e):
                s = src_ref[e]                                       # SMEM scalar
                a = (xp_ref[pl.ds(s, 1), col_src:col_src + 1]        # (1,1) asrc
                     + adst_d + ae_ref[layer_off + e])               # + edge term
                return jnp.where(a > 0, a, NEG_SLOPE * a)            # leaky_relu

            # pass 1: exact per-segment max (PyG softmax shift) -----------------
            m = jax.lax.fori_loop(
                start, end,
                lambda e, m: jnp.maximum(m, edge_logit(e)),
                jnp.full((1, 1), -1e30, dtype=jnp.float32))

            # pass 2: exp weights + weighted sum of gathered xp rows ------------
            def acc_body(e, c):
                den, acc = c
                p = jnp.exp(edge_logit(e) - m)                       # (1,1)
                s = src_ref[e]
                return den + p, acc + p * xp_ref[pl.ds(s, 1), :]
            den, acc = jax.lax.fori_loop(
                start, end, acc_body,
                (jnp.zeros((1, 1), jnp.float32),
                 jnp.zeros((1, c_pad), jnp.float32)))

            # single store per node; approx reciprocal rides the idle EUP slot
            agg_ref[pl.ds(d, 1), :] = acc * pl.reciprocal(
                den + SOFTMAX_EPS, approx=True)
            return carry

        jax.lax.fori_loop(0, n_nodes, node_body, 0)
        # TODO(synk): for large graphs, fully vectorize the logit/exp pass
        # (lane-dense gather of asrc/adst via jnp.take or blocked one-hot on the
        # MXU) and tile nodes/edge-partitions over a "parallel" grid axis with
        # per-core partial accumulators so v7x's second TensorCore is used.

        # conv bias + residual (only for i > 0, as in the module)
        x = agg_ref[...] + bias_ref[i]
        if i > 0:
            x = x + xl
        x = x * col_mask          # zero attention/padding columns (exact zeros)

        # ---- pyg LayerNorm(mode='graph', batch=None): fused whole-graph stats --
        s1 = jnp.sum(x)
        s2 = jnp.sum(x * x)
        mu = s1 * inv_cnt
        var = jnp.maximum(s2 * inv_cnt - mu * mu, 0.0)   # std(unbiased=False)^2
        x = (x - mu) * (1.0 / (jnp.sqrt(var) + NORM_EPS)) * norm_w + norm_b
        # padded columns: (0 - mu) * k * 0 + 0 == 0, so padding stays exact.

        # ---- nonlin = ReLU ------------------------------------------------------
        x = jnp.maximum(x, 0.0)

    # ---- MLP head (lane-dense padded) + sigmoid; column 0 is the real output ---
    # TODO(synk): for large N, emit a node-major (nodes-on-lanes) output tile
    # instead of an (N,128) slab with one real column.
    h = jnp.dot(x, mlp_w1_ref[...], preferred_element_type=jnp.float32) + mlp_b1_ref[...]
    h = jnp.maximum(h, 0.0)
    o = jnp.dot(h, mlp_w2_ref[...], preferred_element_type=jnp.float32) + mlp_b2_ref[...]
    out_ref[...] = jax.nn.sigmoid(o)


def init_params(key, n_relations, channels, layers, edge_dim, hidden):
    keys = list(jax.random.split(key, 6 * layers + layers + 4))
    it = iter(keys)

    def nrm(shape, scale=0.1):
        return scale * jax.random.normal(next(it), shape, dtype=jnp.float32)

    return {
        "channels": channels,
        "W":        jnp.stack([nrm((channels, channels)) for _ in range(layers)]),
        "att_src":  jnp.stack([nrm((1, channels)) for _ in range(layers)]),
        "att_dst":  jnp.stack([nrm((1, channels)) for _ in range(layers)]),
        "att_edge": jnp.stack([nrm((1, channels)) for _ in range(layers)]),
        "lin_edge": jnp.stack([nrm((edge_dim, channels)) for _ in range(layers)]),
        "bias":     jnp.stack([nrm((1, channels), 0.01) for _ in range(layers)]),
        "edge_emb": jnp.stack([nrm((n_relations, edge_dim)) for _ in range(layers)]),
        "norm_w":   jnp.ones((1, channels), jnp.float32),
        "norm_b":   jnp.zeros((1, channels), jnp.float32),
        "mlp_w1":   nrm((channels, hidden)),
        "mlp_b1":   jnp.zeros((1, hidden), jnp.float32),
        "mlp_w2":   nrm((hidden, 1)),
        "mlp_b2":   jnp.zeros((1, 1), jnp.float32),
    }


def _pad2(a, rows, cols):
    out = jnp.zeros((rows, cols), jnp.float32)
    return out.at[:a.shape[0], :a.shape[1]].set(a.astype(jnp.float32))


def gnn_forward(x, edge_index, edge_type, params):
    N = x.shape[0]
    C = params["channels"]
    L = params["W"].shape[0]
    E = edge_index.shape[1]
    assert C + 2 <= C_PAD

    # ---- glue (plain JAX, not the hot path) -----------------------------------
    # x.expand(-1, C), zero-padded to the lane-dense width
    x0 = jnp.zeros((N, C_PAD), jnp.float32)
    x0 = x0.at[:, :C].set(jnp.broadcast_to(x.astype(jnp.float32), (N, C)))

    src = edge_index[0].astype(jnp.int32)             # (E,)  PyG: row 0 = source
    dst = edge_index[1].astype(jnp.int32)             # (E,)       row 1 = target

    # sort edges by destination -> contiguous per-node segments for the softmax
    perm = jnp.argsort(dst)
    src_s = src[perm]
    dst_s = dst[perm]
    seg = jnp.searchsorted(dst_s, jnp.arange(N + 1, dtype=jnp.int32)).astype(jnp.int32)

    # fold <lin_edge_l(emb_l[r]), att_edge_l> into a per-(layer, relation) scalar,
    # then gather per sorted edge -> flat (L*E,) SMEM table
    rel_logit = jnp.einsum("lrd,ldc,lc->lr",
                           params["edge_emb"], params["lin_edge"],
                           params["att_edge"][:, 0, :])               # (L, R)
    ae_flat = rel_logit[:, edge_type[perm]].reshape(-1).astype(jnp.float32)
    # TODO(synk): for very large E, keep the edge table in HBM/VMEM tiles instead
    # of a flat SMEM array.

    # W_ext: lin weights with the att_src / att_dst projections folded into two
    # extra columns (cols C and C+1), so one MXU matmul produces xp, asrc, adst.
    def build_wext(l):
        W = params["W"][l].astype(jnp.float32)
        we = jnp.zeros((C_PAD, C_PAD), jnp.float32)
        we = we.at[:C, :C].set(W)
        we = we.at[:C, C].set(W @ params["att_src"][l][0].astype(jnp.float32))
        we = we.at[:C, C + 1].set(W @ params["att_dst"][l][0].astype(jnp.float32))
        return we
    W_ext = jnp.stack([build_wext(l) for l in range(L)])

    # zero-pad remaining parameters to lane-dense shapes (numerically transparent)
    bias_p = jnp.stack([_pad2(params["bias"][l], 1, C_PAD) for l in range(L)])
    nw_p = _pad2(params["norm_w"], 1, C_PAD)
    nb_p = _pad2(params["norm_b"], 1, C_PAD)
    w1_p = _pad2(params["mlp_w1"], C_PAD, H_PAD)
    b1_p = _pad2(params["mlp_b1"], 1, H_PAD)
    w2_p = _pad2(params["mlp_w2"], H_PAD, C_PAD)
    b2_p = _pad2(params["mlp_b2"], 1, C_PAD)
    # TODO(synk): cast MXU operands to bf16 (f32 accumulate) once N is large
    # enough for the dense phase to dominate on v6e/v7x.

    kernel = functools.partial(gnn_kernel, layers=L, c_real=C, n_edges=E)

    vmem = pl.BlockSpec(memory_space=pltpu.MemorySpace.VMEM)
    smem = pl.BlockSpec(memory_space=pltpu.MemorySpace.SMEM)

    out = pl.pallas_call(
        kernel,
        out_shape=jax.ShapeDtypeStruct((N, C_PAD), jnp.float32),
        in_specs=[smem, smem, smem] + [vmem] * 9,
        out_specs=vmem,
        scratch_shapes=[
            pltpu.VMEM((N, C_PAD), jnp.float32),   # xp  (lin(x) + attention cols)
            pltpu.VMEM((N, C_PAD), jnp.float32),   # agg (per-node aggregated rows)
        ],
        compiler_params=pltpu.CompilerParams(vmem_limit_bytes=32 * 1024 * 1024),
    )(seg, src_s, ae_flat, x0, W_ext, bias_p,
      nw_p, nb_p, w1_p, b1_p, w2_p, b2_p)

    return out[:, :1]          # real head output is column 0 of the lane-dense slab


if __name__ == "__main__":
    N, C, L, EDGE_DIM, NREL, HIDDEN = 16, 32, 3, 8, 5, 100

    key = jax.random.PRNGKey(0)
    k_x, k_e1, k_e2, k_t, k_p = jax.random.split(key, 5)

    # node features: (N, 1), expanded to (N, C) inside forward (as in the module)
    x = jax.random.normal(k_x, (N, 1), dtype=jnp.float32)

    # edges: a ring (so every node has >=1 incoming edge) plus random extras
    ring_src = jnp.arange(N, dtype=jnp.int32)
    ring_dst = (ring_src + 1) % N
    n_rand = 48
    rand_src = jax.random.randint(k_e1, (n_rand,), 0, N, dtype=jnp.int32)
    rand_dst = jax.random.randint(k_e2, (n_rand,), 0, N, dtype=jnp.int32)
    edge_index = jnp.stack([jnp.concatenate([ring_src, rand_src]),
                            jnp.concatenate([ring_dst, rand_dst])])   # (2, E)
    E = edge_index.shape[1]
    edge_type = jax.random.randint(k_t, (E,), 0, NREL, dtype=jnp.int32)

    params = init_params(k_p, NREL, C, L, EDGE_DIM, HIDDEN)

    out = gnn_forward(x, edge_index, edge_type, params)
    out = jax.block_until_ready(out)
    assert out.shape == (N, 1) and out.dtype == jnp.float32
    assert bool(jnp.all(jnp.isfinite(out))) and bool(jnp.all((out >= 0) & (out <= 1)))
    print("KERNEL_OK")
</pallas_src>

<mosaic_0001>
module attributes {stable_mosaic.version = 11 : i64} {
  func.func @gnn_kernel(%arg0: memref<17xi32, #tpu.memory_space<smem>>, %arg1: memref<64xi32, #tpu.memory_space<smem>>, %arg2: memref<192xf32, #tpu.memory_space<smem>>, %arg3: memref<16x128xf32, #tpu.memory_space<vmem>>, %arg4: memref<3x128x128xf32, #tpu.memory_space<vmem>>, %arg5: memref<3x1x128xf32, #tpu.memory_space<vmem>>, %arg6: memref<1x128xf32, #tpu.memory_space<vmem>>, %arg7: memref<1x128xf32, #tpu.memory_space<vmem>>, %arg8: memref<128x128xf32, #tpu.memory_space<vmem>>, %arg9: memref<1x128xf32, #tpu.memory_space<vmem>>, %arg10: memref<128x128xf32, #tpu.memory_space<vmem>>, %arg11: memref<1x128xf32, #tpu.memory_space<vmem>>, %arg12: memref<16x128xf32, #tpu.memory_space<vmem>>, %arg13: memref<16x128xf32, #tpu.memory_space<vmem>>, %arg14: memref<16x128xf32, #tpu.memory_space<vmem>>) attributes {dimension_semantics = [], scalar_prefetch = 0 : i64, scratch_operands = 2 : i64, tpu.core_type = #tpu.core_type<tc>} {
    %c0 = arith.constant 0 : index
    %c0_0 = arith.constant 0 : index
    %0 = vector.load %arg3[%c0, %c0_0] : memref<16x128xf32, #tpu.memory_space<vmem>>, vector<16x128xf32>
    %c0_1 = arith.constant 0 : index
    %c0_2 = arith.constant 0 : index
    %1 = vector.load %arg6[%c0_1, %c0_2] : memref<1x128xf32, #tpu.memory_space<vmem>>, vector<1x128xf32>
    %c0_3 = arith.constant 0 : index
    %c0_4 = arith.constant 0 : index
    %2 = vector.load %arg7[%c0_3, %c0_4] : memref<1x128xf32, #tpu.memory_space<vmem>>, vector<1x128xf32>
    %3 = tpu.iota {dimensions = array<i32: 1>} : vector<1x128xi32>
    %c32_i32 = arith.constant 32 : i32
    %4 = vector.broadcast %c32_i32 : i32 to vector<1x128xi32>
    %5 = arith.cmpi slt, %3, %4 : vector<1x128xi32>
    %6 = arith.extui %5 : vector<1x128xi1> to vector<1x128xi32>
    %7 = arith.sitofp %6 : vector<1x128xi32> to vector<1x128xf32>
    %c0_5 = arith.constant 0 : index
    %c0_6 = arith.constant 0 : index
    %c0_7 = arith.constant 0 : index
    %8 = vector.load %arg4[%c0_5, %c0_6, %c0_7] : memref<3x128x128xf32, #tpu.memory_space<vmem>>, vector<1x128x128xf32>
    %9 = vector.shape_cast %8 : vector<1x128x128xf32> to vector<128x128xf32>
    %cst = arith.constant dense<0.000000e+00> : vector<16x128xf32>
    %10 = tpu.matmul %0, %9, %cst {dimension_numbers = #tpu.dot_dimension_numbers<[1], [0], [0], [1], [0, 0, 1, 1], [], []>} : vector<16x128xf32>, vector<128x128xf32>, vector<16x128xf32> -> vector<16x128xf32>
    %c0_8 = arith.constant 0 : index
    %c0_9 = arith.constant 0 : index
    %11 = vector.load %arg13[%c0_8, %c0_9] : memref<16x128xf32, #tpu.memory_space<vmem>>, vector<16x128xf32>
    tpu.vector_store %arg13[%c0_8, %c0_9], %10 {strides = array<i32>} : memref<16x128xf32, #tpu.memory_space<vmem>>, vector<16x128xf32>,
    %c0_i32 = arith.constant 0 : i32
    %c16_i32 = arith.constant 16 : i32
    %12 = arith.addi %c0_i32, %c16_i32 : i32
    %c1_i32 = arith.constant 1 : i32
    scf.for %arg15 = %c0_i32 to %12 step %c1_i32  : i32 {
      %145 = arith.index_cast %arg15 : i32 to index
      %146 = memref.load %arg0[%145] : memref<17xi32, #tpu.memory_space<smem>>
      %c1_i32_82 = arith.constant 1 : i32
      %147 = arith.addi %arg15, %c1_i32_82 : i32
      %148 = arith.index_cast %147 : i32 to index
      %149 = memref.load %arg0[%148] : memref<17xi32, #tpu.memory_space<smem>>
      %150 = arith.index_cast %arg15 : i32 to index
      %c33 = arith.constant 33 : index
      %151 = vector.load %arg13[%150, %c33] : memref<16x128xf32, #tpu.memory_space<vmem>>, vector<1x1xf32>
      %cst_83 = arith.constant -1.000000e+30 : f32
      %152 = vector.broadcast %cst_83 : f32 to vector<1x1xf32>
      %153 = arith.subi %149, %146 : i32
      %154 = arith.addi %146, %153 : i32
      %c1_i32_84 = arith.constant 1 : i32
      %155 = scf.for %arg16 = %146 to %154 step %c1_i32_84 iter_args(%arg17 = %152) -> (vector<1x1xf32>)  : i32 {
        %168 = arith.index_cast %arg16 : i32 to index
        %169 = memref.load %arg1[%168] : memref<64xi32, #tpu.memory_space<smem>>
        %170 = arith.index_cast %169 : i32 to index
        %c32 = arith.constant 32 : index
        %171 = vector.load %arg13[%170, %c32] : memref<16x128xf32, #tpu.memory_space<vmem>>, vector<1x1xf32>
        %172 = arith.addf %171, %151 : vector<1x1xf32>
        %c0_i32_90 = arith.constant 0 : i32
        %173 = arith.addi %c0_i32_90, %arg16 : i32
        %174 = arith.index_cast %173 : i32 to index
        %175 = memref.load %arg2[%174] : memref<192xf32, #tpu.memory_space<smem>>
        %176 = vector.broadcast %175 : f32 to vector<1x1xf32>
        %177 = arith.addf %172, %176 : vector<1x1xf32>
        %cst_91 = arith.constant 0.000000e+00 : f32
        %178 = vector.broadcast %cst_91 : f32 to vector<1x1xf32>
        %179 = arith.cmpf ogt, %177, %178 : vector<1x1xf32>
        %cst_92 = arith.constant 2.000000e-01 : f32
        %180 = vector.broadcast %cst_92 : f32 to vector<1x1xf32>
        %181 = arith.mulf %180, %177 : vector<1x1xf32>
        %182 = arith.select %179, %177, %181 : vector<1x1xi1>, vector<1x1xf32>
        %183 = arith.maximumf %arg17, %182 : vector<1x1xf32>
        scf.yield %183 : vector<1x1xf32>
      }
      %cst_85 = arith.constant 0.000000e+00 : f32
      %156 = vector.broadcast %cst_85 : f32 to vector<1x1xf32>
      %cst_86 = arith.constant 0.000000e+00 : f32
      %157 = vector.broadcast %cst_86 : f32 to vector<1x128xf32>
      %158 = arith.subi %149, %146 : i32
      %159 = arith.addi %146, %158 : i32
      %c1_i32_87 = arith.constant 1 : i32
      %160:2 = scf.for %arg16 = %146 to %159 step %c1_i32_87 iter_args(%arg17 = %156, %arg18 = %157) -> (vector<1x1xf32>, vector<1x128xf32>)  : i32 {
        %168 = arith.index_cast %arg16 : i32 to index
        %169 = memref.load %arg1[%168] : memref<64xi32, #tpu.memory_space<smem>>
        %170 = arith.index_cast %169 : i32 to index
        %c32 = arith.constant 32 : index
        %171 = vector.load %arg13[%170, %c32] : memref<16x128xf32, #tpu.memory_space<vmem>>, vector<1x1xf32>
        %172 = arith.addf %171, %151 : vector<1x1xf32>
        %c0_i32_90 = arith.constant 0 : i32
        %173 = arith.addi %c0_i32_90, %arg16 : i32
        %174 = arith.index_cast %173 : i32 to index
        %175 = memref.load %arg2[%174] : memref<192xf32, #tpu.memory_space<smem>>
        %176 = vector.broadcast %175 : f32 to vector<1x1xf32>
        %177 = arith.addf %172, %176 : vector<1x1xf32>
        %cst_91 = arith.constant 0.000000e+00 : f32
        %178 = vector.broadcast %cst_91 : f32 to vector<1x1xf32>
        %179 = arith.cmpf ogt, %177, %178 : vector<1x1xf32>
        %cst_92 = arith.constant 2.000000e-01 : f32
        %180 = vector.broadcast %cst_92 : f32 to vector<1x1xf32>
        %181 = arith.mulf %180, %177 : vector<1x1xf32>
        %182 = arith.select %179, %177, %181 : vector<1x1xi1>, vector<1x1xf32>
        %183 = arith.subf %182, %155 : vector<1x1xf32>
        %184 = math.exp %183 : vector<1x1xf32>
        %185 = arith.index_cast %arg16 : i32 to index
        %186 = memref.load %arg1[%185] : memref<64xi32, #tpu.memory_space<smem>>
        %187 = arith.addf %arg17, %184 : vector<1x1xf32>
        %188 = arith.index_cast %186 : i32 to index
        %c0_93 = arith.constant 0 : index
        %189 = vector.load %arg13[%188, %c0_93] : memref<16x128xf32, #tpu.memory_space<vmem>>, vector<1x128xf32>
        %190 = vector.broadcast %184 : vector<1x1xf32> to vector<1x128xf32>
        %191 = arith.mulf %190, %189 : vector<1x128xf32>
        %192 = arith.addf %arg18, %191 : vector<1x128xf32>
        scf.yield %187, %192 : vector<1x1xf32>, vector<1x128xf32>
      }
      %cst_88 = arith.constant 1.000000e-16 : f32
      %161 = vector.broadcast %cst_88 : f32 to vector<1x1xf32>
      %162 = arith.addf %160#0, %161 : vector<1x1xf32>
      %163 = tpu.reciprocal %162 {approx = true} : vector<1x1xf32> -> vector<1x1xf32>
      %164 = vector.broadcast %163 : vector<1x1xf32> to vector<1x128xf32>
      %165 = arith.mulf %160#1, %164 : vector<1x128xf32>
      %166 = arith.index_cast %arg15 : i32 to index
      %c0_89 = arith.constant 0 : index
      %167 = vector.load %arg14[%166, %c0_89] : memref<16x128xf32, #tpu.memory_space<vmem>>, vector<1x128xf32>
      tpu.vector_store %arg14[%166, %c0_89], %165 {strides = array<i32>} : memref<16x128xf32, #tpu.memory_space<vmem>>, vector<1x128xf32>,
    }
    %c16_i32_10 = arith.constant 16 : i32
    %c0_11 = arith.constant 0 : index
    %c0_12 = arith.constant 0 : index
    %13 = vector.load %arg14[%c0_11, %c0_12] : memref<16x128xf32, #tpu.memory_space<vmem>>, vector<16x128xf32>
    %c0_13 = arith.constant 0 : index
    %c0_14 = arith.constant 0 : index
    %c0_15 = arith.constant 0 : index
    %14 = vector.load %arg5[%c0_13, %c0_14, %c0_15] : memref<3x1x128xf32, #tpu.memory_space<vmem>>, vector<1x1x128xf32>
    %15 = vector.shape_cast %14 : vector<1x1x128xf32> to vector<1x128xf32>
    %16 = vector.broadcast %15 : vector<1x128xf32> to vector<16x128xf32>
    %17 = arith.addf %13, %16 : vector<16x128xf32>
    %18 = vector.broadcast %7 : vector<1x128xf32> to vector<16x128xf32>
    %19 = arith.mulf %17, %18 : vector<16x128xf32>
    %20 = vector.shape_cast %19 : vector<16x128xf32> to vector<1x16x128xf32>
    %cst_16 = arith.constant dense<0.000000e+00> : vector<1xf32>
    %21 = vector.multi_reduction <add>, %20, %cst_16 [1, 2] : vector<1x16x128xf32> to vector<1xf32>
    %22 = vector.shape_cast %21 : vector<1xf32> to vector<1x1x1xf32>
    %23 = vector.extract %22[0, 0, 0] : f32 from vector<1x1x1xf32>
    %24 = arith.mulf %19, %19 : vector<16x128xf32>
    %25 = vector.shape_cast %24 : vector<16x128xf32> to vector<1x16x128xf32>
    %cst_17 = arith.constant dense<0.000000e+00> : vector<1xf32>
    %26 = vector.multi_reduction <add>, %25, %cst_17 [1, 2] : vector<1x16x128xf32> to vector<1xf32>
    %27 = vector.shape_cast %26 : vector<1xf32> to vector<1x1x1xf32>
    %28 = vector.extract %27[0, 0, 0] : f32 from vector<1x1x1xf32>
    %cst_18 = arith.constant 0.001953125 : f32
    %29 = arith.mulf %23, %cst_18 : f32
    %cst_19 = arith.constant 0.001953125 : f32
    %30 = arith.mulf %28, %cst_19 : f32
    %31 = arith.mulf %29, %29 : f32
    %32 = arith.subf %30, %31 : f32
    %cst_20 = arith.constant 0.000000e+00 : f32
    %33 = arith.maximumf %32, %cst_20 : f32
    %34 = vector.broadcast %29 : f32 to vector<16x128xf32>
    %35 = arith.subf %19, %34 : vector<16x128xf32>
    %36 = math.sqrt %33 : f32
    %cst_21 = arith.constant 9.99999974E-6 : f32
    %37 = arith.addf %36, %cst_21 : f32
    %cst_22 = arith.constant 1.000000e+00 : f32
    %38 = arith.divf %cst_22, %37 : f32
    %39 = vector.broadcast %38 : f32 to vector<16x128xf32>
    %40 = arith.mulf %35, %39 : vector<16x128xf32>
    %41 = vector.broadcast %1 : vector<1x128xf32> to vector<16x128xf32>
    %42 = arith.mulf %40, %41 : vector<16x128xf32>
    %43 = vector.broadcast %2 : vector<1x128xf32> to vector<16x128xf32>
    %44 = arith.addf %42, %43 : vector<16x128xf32>
    %cst_23 = arith.constant 0.000000e+00 : f32
    %45 = vector.broadcast %cst_23 : f32 to vector<16x128xf32>
    %46 = arith.maximumf %44, %45 : vector<16x128xf32>
    %c1 = arith.constant 1 : index
    %c0_24 = arith.constant 0 : index
    %c0_25 = arith.constant 0 : index
    %47 = vector.load %arg4[%c1, %c0_24, %c0_25] : memref<3x128x128xf32, #tpu.memory_space<vmem>>, vector<1x128x128xf32>
    %48 = vector.shape_cast %47 : vector<1x128x128xf32> to vector<128x128xf32>
    %cst_26 = arith.constant dense<0.000000e+00> : vector<16x128xf32>
    %49 = tpu.matmul %46, %48, %cst_26 {dimension_numbers = #tpu.dot_dimension_numbers<[1], [0], [0], [1], [0, 0, 1, 1], [], []>} : vector<16x128xf32>, vector<128x128xf32>, vector<16x128xf32> -> vector<16x128xf32>
    %c0_27 = arith.constant 0 : index
    %c0_28 = arith.constant 0 : index
    %50 = vector.load %arg13[%c0_27, %c0_28] : memref<16x128xf32, #tpu.memory_space<vmem>>, vector<16x128xf32>
    tpu.vector_store %arg13[%c0_27, %c0_28], %49 {strides = array<i32>} : memref<16x128xf32, #tpu.memory_space<vmem>>, vector<16x128xf32>,
    %c0_i32_29 = arith.constant 0 : i32
    %c16_i32_30 = arith.constant 16 : i32
    %51 = arith.addi %c0_i32_29, %c16_i32_30 : i32
    %c1_i32_31 = arith.constant 1 : i32
    scf.for %arg15 = %c0_i32_29 to %51 step %c1_i32_31  : i32 {
      %145 = arith.index_cast %arg15 : i32 to index
      %146 = memref.load %arg0[%145] : memref<17xi32, #tpu.memory_space<smem>>
      %c1_i32_82 = arith.constant 1 : i32
      %147 = arith.addi %arg15, %c1_i32_82 : i32
      %148 = arith.index_cast %147 : i32 to index
      %149 = memref.load %arg0[%148] : memref<17xi32, #tpu.memory_space<smem>>
      %150 = arith.index_cast %arg15 : i32 to index
      %c33 = arith.constant 33 : index
      %151 = vector.load %arg13[%150, %c33] : memref<16x128xf32, #tpu.memory_space<vmem>>, vector<1x1xf32>
      %cst_83 = arith.constant -1.000000e+30 : f32
      %152 = vector.broadcast %cst_83 : f32 to vector<1x1xf32>
      %153 = arith.subi %149, %146 : i32
      %154 = arith.addi %146, %153 : i32
      %c1_i32_84 = arith.constant 1 : i32
      %155 = scf.for %arg16 = %146 to %154 step %c1_i32_84 iter_args(%arg17 = %152) -> (vector<1x1xf32>)  : i32 {
        %168 = arith.index_cast %arg16 : i32 to index
        %169 = memref.load %arg1[%168] : memref<64xi32, #tpu.memory_space<smem>>
        %170 = arith.index_cast %169 : i32 to index
        %c32 = arith.constant 32 : index
        %171 = vector.load %arg13[%170, %c32] : memref<16x128xf32, #tpu.memory_space<vmem>>, vector<1x1xf32>
        %172 = arith.addf %171, %151 : vector<1x1xf32>
        %c64_i32 = arith.constant 64 : i32
        %173 = arith.addi %c64_i32, %arg16 : i32
        %174 = arith.index_cast %173 : i32 to index
        %175 = memref.load %arg2[%174] : memref<192xf32, #tpu.memory_space<smem>>
        %176 = vector.broadcast %175 : f32 to vector<1x1xf32>
        %177 = arith.addf %172, %176 : vector<1x1xf32>
        %cst_90 = arith.constant 0.000000e+00 : f32
        %178 = vector.broadcast %cst_90 : f32 to vector<1x1xf32>
        %179 = arith.cmpf ogt, %177, %178 : vector<1x1xf32>
        %cst_91 = arith.constant 2.000000e-01 : f32
        %180 = vector.broadcast %cst_91 : f32 to vector<1x1xf32>
        %181 = arith.mulf %180, %177 : vector<1x1xf32>
        %182 = arith.select %179, %177, %181 : vector<1x1xi1>, vector<1x1xf32>
        %183 = arith.maximumf %arg17, %182 : vector<1x1xf32>
        scf.yield %183 : vector<1x1xf32>
      }
      %cst_85 = arith.constant 0.000000e+00 : f32
      %156 = vector.broadcast %cst_85 : f32 to vector<1x1xf32>
      %cst_86 = arith.constant 0.000000e+00 : f32
      %157 = vector.broadcast %cst_86 : f32 to vector<1x128xf32>
      %158 = arith.subi %149, %146 : i32
      %159 = arith.addi %146, %158 : i32
      %c1_i32_87 = arith.constant 1 : i32
      %160:2 = scf.for %arg16 = %146 to %159 step %c1_i32_87 iter_args(%arg17 = %156, %arg18 = %157) -> (vector<1x1xf32>, vector<1x128xf32>)  : i32 {
        %168 = arith.index_cast %arg16 : i32 to index
        %169 = memref.load %arg1[%168] : memref<64xi32, #tpu.memory_space<smem>>
        %170 = arith.index_cast %169 : i32 to index
        %c32 = arith.constant 32 : index
        %171 = vector.load %arg13[%170, %c32] : memref<16x128xf32, #tpu.memory_space<vmem>>, vector<1x1xf32>
        %172 = arith.addf %171, %151 : vector<1x1xf32>
        %c64_i32 = arith.constant 64 : i32
        %173 = arith.addi %c64_i32, %arg16 : i32
        %174 = arith.index_cast %173 : i32 to index
        %175 = memref.load %arg2[%174] : memref<192xf32, #tpu.memory_space<smem>>
        %176 = vector.broadcast %175 : f32 to vector<1x1xf32>
        %177 = arith.addf %172, %176 : vector<1x1xf32>
        %cst_90 = arith.constant 0.000000e+00 : f32
        %178 = vector.broadcast %cst_90 : f32 to vector<1x1xf32>
        %179 = arith.cmpf ogt, %177, %178 : vector<1x1xf32>
        %cst_91 = arith.constant 2.000000e-01 : f32
        %180 = vector.broadcast %cst_91 : f32 to vector<1x1xf32>
        %181 = arith.mulf %180, %177 : vector<1x1xf32>
        %182 = arith.select %179, %177, %181 : vector<1x1xi1>, vector<1x1xf32>
        %183 = arith.subf %182, %155 : vector<1x1xf32>
        %184 = math.exp %183 : vector<1x1xf32>
        %185 = arith.index_cast %arg16 : i32 to index
        %186 = memref.load %arg1[%185] : memref<64xi32, #tpu.memory_space<smem>>
        %187 = arith.addf %arg17, %184 : vector<1x1xf32>
        %188 = arith.index_cast %186 : i32 to index
        %c0_92 = arith.constant 0 : index
        %189 = vector.load %arg13[%188, %c0_92] : memref<16x128xf32, #tpu.memory_space<vmem>>, vector<1x128xf32>
        %190 = vector.broadcast %184 : vector<1x1xf32> to vector<1x128xf32>
        %191 = arith.mulf %190, %189 : vector<1x128xf32>
        %192 = arith.addf %arg18, %191 : vector<1x128xf32>
        scf.yield %187, %192 : vector<1x1xf32>, vector<1x128xf32>
      }
      %cst_88 = arith.constant 1.000000e-16 : f32
      %161 = vector.broadcast %cst_88 : f32 to vector<1x1xf32>
      %162 = arith.addf %160#0, %161 : vector<1x1xf32>
      %163 = tpu.reciprocal %162 {approx = true} : vector<1x1xf32> -> vector<1x1xf32>
      %164 = vector.broadcast %163 : vector<1x1xf32> to vector<1x128xf32>
      %165 = arith.mulf %160#1, %164 : vector<1x128xf32>
      %166 = arith.index_cast %arg15 : i32 to index
      %c0_89 = arith.constant 0 : index
      %167 = vector.load %arg14[%166, %c0_89] : memref<16x128xf32, #tpu.memory_space<vmem>>, vector<1x128xf32>
      tpu.vector_store %arg14[%166, %c0_89], %165 {strides = array<i32>} : memref<16x128xf32, #tpu.memory_space<vmem>>, vector<1x128xf32>,
    }
    %c16_i32_32 = arith.constant 16 : i32
    %c0_33 = arith.constant 0 : index
    %c0_34 = arith.constant 0 : index
    %52 = vector.load %arg14[%c0_33, %c0_34] : memref<16x128xf32, #tpu.memory_space<vmem>>, vector<16x128xf32>
    %c1_35 = arith.constant 1 : index
    %c0_36 = arith.constant 0 : index
    %c0_37 = arith.constant 0 : index
    %53 = vector.load %arg5[%c1_35, %c0_36, %c0_37] : memref<3x1x128xf32, #tpu.memory_space<vmem>>, vector<1x1x128xf32>
    %54 = vector.shape_cast %53 : vector<1x1x128xf32> to vector<1x128xf32>
    %55 = vector.broadcast %54 : vector<1x128xf32> to vector<16x128xf32>
    %56 = arith.addf %52, %55 : vector<16x128xf32>
    %57 = arith.addf %56, %46 : vector<16x128xf32>
    %58 = vector.broadcast %7 : vector<1x128xf32> to vector<16x128xf32>
    %59 = arith.mulf %57, %58 : vector<16x128xf32>
    %60 = vector.shape_cast %59 : vector<16x128xf32> to vector<1x16x128xf32>
    %cst_38 = arith.constant dense<0.000000e+00> : vector<1xf32>
    %61 = vector.multi_reduction <add>, %60, %cst_38 [1, 2] : vector<1x16x128xf32> to vector<1xf32>
    %62 = vector.shape_cast %61 : vector<1xf32> to vector<1x1x1xf32>
    %63 = vector.extract %62[0, 0, 0] : f32 from vector<1x1x1xf32>
    %64 = arith.mulf %59, %59 : vector<16x128xf32>
    %65 = vector.shape_cast %64 : vector<16x128xf32> to vector<1x16x128xf32>
    %cst_39 = arith.constant dense<0.000000e+00> : vector<1xf32>
    %66 = vector.multi_reduction <add>, %65, %cst_39 [1, 2] : vector<1x16x128xf32> to vector<1xf32>
    %67 = vector.shape_cast %66 : vector<1xf32> to vector<1x1x1xf32>
    %68 = vector.extract %67[0, 0, 0] : f32 from vector<1x1x1xf32>
    %cst_40 = arith.constant 0.001953125 : f32
    %69 = arith.mulf %63, %cst_40 : f32
    %cst_41 = arith.constant 0.001953125 : f32
    %70 = arith.mulf %68, %cst_41 : f32
    %71 = arith.mulf %69, %69 : f32
    %72 = arith.subf %70, %71 : f32
    %cst_42 = arith.constant 0.000000e+00 : f32
    %73 = arith.maximumf %72, %cst_42 : f32
    %74 = vector.broadcast %69 : f32 to vector<16x128xf32>
    %75 = arith.subf %59, %74 : vector<16x128xf32>
    %76 = math.sqrt %73 : f32
    %cst_43 = arith.constant 9.99999974E-6 : f32
    %77 = arith.addf %76, %cst_43 : f32
    %cst_44 = arith.constant 1.000000e+00 : f32
    %78 = arith.divf %cst_44, %77 : f32
    %79 = vector.broadcast %78 : f32 to vector<16x128xf32>
    %80 = arith.mulf %75, %79 : vector<16x128xf32>
    %81 = vector.broadcast %1 : vector<1x128xf32> to vector<16x128xf32>
    %82 = arith.mulf %80, %81 : vector<16x128xf32>
    %83 = vector.broadcast %2 : vector<1x128xf32> to vector<16x128xf32>
    %84 = arith.addf %82, %83 : vector<16x128xf32>
    %cst_45 = arith.constant 0.000000e+00 : f32
    %85 = vector.broadcast %cst_45 : f32 to vector<16x128xf32>
    %86 = arith.maximumf %84, %85 : vector<16x128xf32>
    %c2 = arith.constant 2 : index
    %c0_46 = arith.constant 0 : index
    %c0_47 = arith.constant 0 : index
    %87 = vector.load %arg4[%c2, %c0_46, %c0_47] : memref<3x128x128xf32, #tpu.memory_space<vmem>>, vector<1x128x128xf32>
    %88 = vector.shape_cast %87 : vector<1x128x128xf32> to vector<128x128xf32>
    %cst_48 = arith.constant dense<0.000000e+00> : vector<16x128xf32>
    %89 = tpu.matmul %86, %88, %cst_48 {dimension_numbers = #tpu.dot_dimension_numbers<[1], [0], [0], [1], [0, 0, 1, 1], [], []>} : vector<16x128xf32>, vector<128x128xf32>, vector<16x128xf32> -> vector<16x128xf32>
    %c0_49 = arith.constant 0 : index
    %c0_50 = arith.constant 0 : index
    %90 = vector.load %arg13[%c0_49, %c0_50] : memref<16x128xf32, #tpu.memory_space<vmem>>, vector<16x128xf32>
    tpu.vector_store %arg13[%c0_49, %c0_50], %89 {strides = array<i32>} : memref<16x128xf32, #tpu.memory_space<vmem>>, vector<16x128xf32>,
    %c0_i32_51 = arith.constant 0 : i32
    %c16_i32_52 = arith.constant 16 : i32
    %91 = arith.addi %c0_i32_51, %c16_i32_52 : i32
    %c1_i32_53 = arith.constant 1 : i32
    scf.for %arg15 = %c0_i32_51 to %91 step %c1_i32_53  : i32 {
      %145 = arith.index_cast %arg15 : i32 to index
      %146 = memref.load %arg0[%145] : memref<17xi32, #tpu.memory_space<smem>>
      %c1_i32_82 = arith.constant 1 : i32
      %147 = arith.addi %arg15, %c1_i32_82 : i32
      %148 = arith.index_cast %147 : i32 to index
      %149 = memref.load %arg0[%148] : memref<17xi32, #tpu.memory_space<smem>>
      %150 = arith.index_cast %arg15 : i32 to index
      %c33 = arith.constant 33 : index
      %151 = vector.load %arg13[%150, %c33] : memref<16x128xf32, #tpu.memory_space<vmem>>, vector<1x1xf32>
      %cst_83 = arith.constant -1.000000e+30 : f32
      %152 = vector.broadcast %cst_83 : f32 to vector<1x1xf32>
      %153 = arith.subi %149, %146 : i32
      %154 = arith.addi %146, %153 : i32
      %c1_i32_84 = arith.constant 1 : i32
      %155 = scf.for %arg16 = %146 to %154 step %c1_i32_84 iter_args(%arg17 = %152) -> (vector<1x1xf32>)  : i32 {
        %168 = arith.index_cast %arg16 : i32 to index
        %169 = memref.load %arg1[%168] : memref<64xi32, #tpu.memory_space<smem>>
        %170 = arith.index_cast %169 : i32 to index
        %c32 = arith.constant 32 : index
        %171 = vector.load %arg13[%170, %c32] : memref<16x128xf32, #tpu.memory_space<vmem>>, vector<1x1xf32>
        %172 = arith.addf %171, %151 : vector<1x1xf32>
        %c128_i32 = arith.constant 128 : i32
        %173 = arith.addi %c128_i32, %arg16 : i32
        %174 = arith.index_cast %173 : i32 to index
        %175 = memref.load %arg2[%174] : memref<192xf32, #tpu.memory_space<smem>>
        %176 = vector.broadcast %175 : f32 to vector<1x1xf32>
        %177 = arith.addf %172, %176 : vector<1x1xf32>
        %cst_90 = arith.constant 0.000000e+00 : f32
        %178 = vector.broadcast %cst_90 : f32 to vector<1x1xf32>
        %179 = arith.cmpf ogt, %177, %178 : vector<1x1xf32>
        %cst_91 = arith.constant 2.000000e-01 : f32
        %180 = vector.broadcast %cst_91 : f32 to vector<1x1xf32>
        %181 = arith.mulf %180, %177 : vector<1x1xf32>
        %182 = arith.select %179, %177, %181 : vector<1x1xi1>, vector<1x1xf32>
        %183 = arith.maximumf %arg17, %182 : vector<1x1xf32>
        scf.yield %183 : vector<1x1xf32>
      }
      %cst_85 = arith.constant 0.000000e+00 : f32
      %156 = vector.broadcast %cst_85 : f32 to vector<1x1xf32>
      %cst_86 = arith.constant 0.000000e+00 : f32
      %157 = vector.broadcast %cst_86 : f32 to vector<1x128xf32>
      %158 = arith.subi %149, %146 : i32
      %159 = arith.addi %146, %158 : i32
      %c1_i32_87 = arith.constant 1 : i32
      %160:2 = scf.for %arg16 = %146 to %159 step %c1_i32_87 iter_args(%arg17 = %156, %arg18 = %157) -> (vector<1x1xf32>, vector<1x128xf32>)  : i32 {
        %168 = arith.index_cast %arg16 : i32 to index
        %169 = memref.load %arg1[%168] : memref<64xi32, #tpu.memory_space<smem>>
        %170 = arith.index_cast %169 : i32 to index
        %c32 = arith.constant 32 : index
        %171 = vector.load %arg13[%170, %c32] : memref<16x128xf32, #tpu.memory_space<vmem>>, vector<1x1xf32>
        %172 = arith.addf %171, %151 : vector<1x1xf32>
        %c128_i32 = arith.constant 128 : i32
        %173 = arith.addi %c128_i32, %arg16 : i32
        %174 = arith.index_cast %173 : i32 to index
        %175 = memref.load %arg2[%174] : memref<192xf32, #tpu.memory_space<smem>>
        %176 = vector.broadcast %175 : f32 to vector<1x1xf32>
        %177 = arith.addf %172, %176 : vector<1x1xf32>
        %cst_90 = arith.constant 0.000000e+00 : f32
        %178 = vector.broadcast %cst_90 : f32 to vector<1x1xf32>
        %179 = arith.cmpf ogt, %177, %178 : vector<1x1xf32>
        %cst_91 = arith.constant 2.000000e-01 : f32
        %180 = vector.broadcast %cst_91 : f32 to vector<1x1xf32>
        %181 = arith.mulf %180, %177 : vector<1x1xf32>
        %182 = arith.select %179, %177, %181 : vector<1x1xi1>, vector<1x1xf32>
        %183 = arith.subf %182, %155 : vector<1x1xf32>
        %184 = math.exp %183 : vector<1x1xf32>
        %185 = arith.index_cast %arg16 : i32 to index
        %186 = memref.load %arg1[%185] : memref<64xi32, #tpu.memory_space<smem>>
        %187 = arith.addf %arg17, %184 : vector<1x1xf32>
        %188 = arith.index_cast %186 : i32 to index
        %c0_92 = arith.constant 0 : index
        %189 = vector.load %arg13[%188, %c0_92] : memref<16x128xf32, #tpu.memory_space<vmem>>, vector<1x128xf32>
        %190 = vector.broadcast %184 : vector<1x1xf32> to vector<1x128xf32>
        %191 = arith.mulf %190, %189 : vector<1x128xf32>
        %192 = arith.addf %arg18, %191 : vector<1x128xf32>
        scf.yield %187, %192 : vector<1x1xf32>, vector<1x128xf32>
      }
      %cst_88 = arith.constant 1.000000e-16 : f32
      %161 = vector.broadcast %cst_88 : f32 to vector<1x1xf32>
      %162 = arith.addf %160#0, %161 : vector<1x1xf32>
      %163 = tpu.reciprocal %162 {approx = true} : vector<1x1xf32> -> vector<1x1xf32>
      %164 = vector.broadcast %163 : vector<1x1xf32> to vector<1x128xf32>
      %165 = arith.mulf %160#1, %164 : vector<1x128xf32>
      %166 = arith.index_cast %arg15 : i32 to index
      %c0_89 = arith.constant 0 : index
      %167 = vector.load %arg14[%166, %c0_89] : memref<16x128xf32, #tpu.memory_space<vmem>>, vector<1x128xf32>
      tpu.vector_store %arg14[%166, %c0_89], %165 {strides = array<i32>} : memref<16x128xf32, #tpu.memory_space<vmem>>, vector<1x128xf32>,
    }
    %c16_i32_54 = arith.constant 16 : i32
    %c0_55 = arith.constant 0 : index
    %c0_56 = arith.constant 0 : index
    %92 = vector.load %arg14[%c0_55, %c0_56] : memref<16x128xf32, #tpu.memory_space<vmem>>, vector<16x128xf32>
    %c2_57 = arith.constant 2 : index
    %c0_58 = arith.constant 0 : index
    %c0_59 = arith.constant 0 : index
    %93 = vector.load %arg5[%c2_57, %c0_58, %c0_59] : memref<3x1x128xf32, #tpu.memory_space<vmem>>, vector<1x1x128xf32>
    %94 = vector.shape_cast %93 : vector<1x1x128xf32> to vector<1x128xf32>
    %95 = vector.broadcast %94 : vector<1x128xf32> to vector<16x128xf32>
    %96 = arith.addf %92, %95 : vector<16x128xf32>
    %97 = arith.addf %96, %86 : vector<16x128xf32>
    %98 = vector.broadcast %7 : vector<1x128xf32> to vector<16x128xf32>
    %99 = arith.mulf %97, %98 : vector<16x128xf32>
    %100 = vector.shape_cast %99 : vector<16x128xf32> to vector<1x16x128xf32>
    %cst_60 = arith.constant dense<0.000000e+00> : vector<1xf32>
    %101 = vector.multi_reduction <add>, %100, %cst_60 [1, 2] : vector<1x16x128xf32> to vector<1xf32>
    %102 = vector.shape_cast %101 : vector<1xf32> to vector<1x1x1xf32>
    %103 = vector.extract %102[0, 0, 0] : f32 from vector<1x1x1xf32>
    %104 = arith.mulf %99, %99 : vector<16x128xf32>
    %105 = vector.shape_cast %104 : vector<16x128xf32> to vector<1x16x128xf32>
    %cst_61 = arith.constant dense<0.000000e+00> : vector<1xf32>
    %106 = vector.multi_reduction <add>, %105, %cst_61 [1, 2] : vector<1x16x128xf32> to vector<1xf32>
    %107 = vector.shape_cast %106 : vector<1xf32> to vector<1x1x1xf32>
    %108 = vector.extract %107[0, 0, 0] : f32 from vector<1x1x1xf32>
    %cst_62 = arith.constant 0.001953125 : f32
    %109 = arith.mulf %103, %cst_62 : f32
    %cst_63 = arith.constant 0.001953125 : f32
    %110 = arith.mulf %108, %cst_63 : f32
    %111 = arith.mulf %109, %109 : f32
    %112 = arith.subf %110, %111 : f32
    %cst_64 = arith.constant 0.000000e+00 : f32
    %113 = arith.maximumf %112, %cst_64 : f32
    %114 = vector.broadcast %109 : f32 to vector<16x128xf32>
    %115 = arith.subf %99, %114 : vector<16x128xf32>
    %116 = math.sqrt %113 : f32
    %cst_65 = arith.constant 9.99999974E-6 : f32
    %117 = arith.addf %116, %cst_65 : f32
    %cst_66 = arith.constant 1.000000e+00 : f32
    %118 = arith.divf %cst_66, %117 : f32
    %119 = vector.broadcast %118 : f32 to vector<16x128xf32>
    %120 = arith.mulf %115, %119 : vector<16x128xf32>
    %121 = vector.broadcast %1 : vector<1x128xf32> to vector<16x128xf32>
    %122 = arith.mulf %120, %121 : vector<16x128xf32>
    %123 = vector.broadcast %2 : vector<1x128xf32> to vector<16x128xf32>
    %124 = arith.addf %122, %123 : vector<16x128xf32>
    %cst_67 = arith.constant 0.000000e+00 : f32
    %125 = vector.broadcast %cst_67 : f32 to vector<16x128xf32>
    %126 = arith.maximumf %124, %125 : vector<16x128xf32>
    %c0_68 = arith.constant 0 : index
    %c0_69 = arith.constant 0 : index
    %127 = vector.load %arg8[%c0_68, %c0_69] : memref<128x128xf32, #tpu.memory_space<vmem>>, vector<128x128xf32>
    %cst_70 = arith.constant dense<0.000000e+00> : vector<16x128xf32>
    %128 = tpu.matmul %126, %127, %cst_70 {dimension_numbers = #tpu.dot_dimension_numbers<[1], [0], [0], [1], [0, 0, 1, 1], [], []>} : vector<16x128xf32>, vector<128x128xf32>, vector<16x128xf32> -> vector<16x128xf32>
    %c0_71 = arith.constant 0 : index
    %c0_72 = arith.constant 0 : index
    %129 = vector.load %arg9[%c0_71, %c0_72] : memref<1x128xf32, #tpu.memory_space<vmem>>, vector<1x128xf32>
    %130 = vector.broadcast %129 : vector<1x128xf32> to vector<16x128xf32>
    %131 = arith.addf %128, %130 : vector<16x128xf32>
    %cst_73 = arith.constant 0.000000e+00 : f32
    %132 = vector.broadcast %cst_73 : f32 to vector<16x128xf32>
    %133 = arith.maximumf %131, %132 : vector<16x128xf32>
    %c0_74 = arith.constant 0 : index
    %c0_75 = arith.constant 0 : index
    %134 = vector.load %arg10[%c0_74, %c0_75] : memref<128x128xf32, #tpu.memory_space<vmem>>, vector<128x128xf32>
    %cst_76 = arith.constant dense<0.000000e+00> : vector<16x128xf32>
    %135 = tpu.matmul %133, %134, %cst_76 {dimension_numbers = #tpu.dot_dimension_numbers<[1], [0], [0], [1], [0, 0, 1, 1], [], []>} : vector<16x128xf32>, vector<128x128xf32>, vector<16x128xf32> -> vector<16x128xf32>
    %c0_77 = arith.constant 0 : index
    %c0_78 = arith.constant 0 : index
    %136 = vector.load %arg11[%c0_77, %c0_78] : memref<1x128xf32, #tpu.memory_space<vmem>>, vector<1x128xf32>
    %137 = vector.broadcast %136 : vector<1x128xf32> to vector<16x128xf32>
    %138 = arith.addf %135, %137 : vector<16x128xf32>
    %139 = arith.negf %138 : vector<16x128xf32>
    %140 = math.exp %139 : vector<16x128xf32>
    %cst_79 = arith.constant 1.000000e+00 : f32
    %141 = vector.broadcast %cst_79 : f32 to vector<16x128xf32>
    %142 = arith.addf %141, %140 : vector<16x128xf32>
    %143 = arith.divf %141, %142 : vector<16x128xf32>
    %c0_80 = arith.constant 0 : index
    %c0_81 = arith.constant 0 : index
    %144 = vector.load %arg12[%c0_80, %c0_81] : memref<16x128xf32, #tpu.memory_space<vmem>>, vector<16x128xf32>
    tpu.vector_store %arg12[%c0_80, %c0_81], %143 {strides = array<i32>} : memref<16x128xf32, #tpu.memory_space<vmem>>, vector<16x128xf32>,
    return
  }
}

</mosaic_0001>

<bundles_post_ra>
// kernel: tpu_custom_call.1
= control target key start
LH: loop header
LB: loop body
LE: loop exit
PB: predicated region body
PF: predicated region fallthrough
CT: control target
= control target key end

     0   :  { %17 = vsyncpa [#allocation7], 0  ;;  %s2105_s0 = inlined_call_operand.hbm [shape: s32[17], index: 0, kind: input, shape index: {}]   ;;  %s2106_s1 = inlined_call_operand.hbm [shape: s32[64], index: 1, kind: input, shape index: {}]   ;;  %s2107_s2 = inlined_call_operand.hbm [shape: f32[192], index: 2, kind: input, shape index: {}]   ;;  %s2108_s3 = inlined_call_operand.hbm [shape: f32[16,128], index: 3, kind: input, shape index: {}]   ;;  %s2109_s4 = inlined_call_operand.hbm [shape: f32[3,128,128], index: 4, kind: input, shape index: {}]   ;;  %s2110_s5 = inlined_call_operand.vmem [shape: f32[3,1,128], index: 5, kind: input, shape index: {}]   ;;  %s2111_s6 = inlined_call_operand.vmem [shape: f32[1,128], index: 6, kind: input, shape index: {}]   ;;  %s2112_s7 = inlined_call_operand.vmem [shape: f32[1,128], index: 7, kind: input, shape index: {}]   ;;  %s2113_s8 = inlined_call_operand.hbm [shape: f32[128,128], index: 8, kind: input, shape index: {}]   ;;  %s2114_s9 = inlined_call_operand.vmem [shape: f32[1,128], index: 9, kind: input, shape index: {}]   ;;  %s2115_s10 = inlined_call_operand.hbm [shape: f32[128,128], index: 10, kind: input, shape index: {}]   ;;  %s2116_s11 = inlined_call_operand.vmem [shape: f32[1,128], index: 11, kind: input, shape index: {}]   ;;  %s2117_s12 = inlined_call_operand.hbm [shape: f32[16,128], index: 12, kind: output, shape index: {}]  }
   0x1   :  { %18 = vsyncpa [#allocation9], 0 }
   0x2   :  { %19 = vsyncpa [#allocation5], 0 }
   0x3   :  { %20 = vsyncpa [#allocation13], 0 }
   0x4   :  { %21 = vsyncpa [#allocation16], 0  ;;  %s37_s23 = sshll.u32 %s2106_s1, 4  ;;  %s38_s23 = int_to_ptr.hbm [resolvable:$true] %s37_s23 }
   0x5   :  { %22 = vsyncpa [#allocation6], 0  ;;  %s1706_s24 = smov [#allocation8]   ;;  %s67_s27 = sshll.u32 %s2109_s4, 4  ;;  %s68_s27 = int_to_ptr.hbm [resolvable:$true] %s67_s27 }
   0x6   :  { %40 = dma.hbm_to_smem %s38_s23, 16, %s1706_s24, [#allocation9]  }
   0x7   :  { %s1707_s28 = smov [#allocation12]   ;;  %s28_s14 = sshll.u32 %s2105_s0, 4  ;;  %s29_s14 = int_to_ptr.hbm [resolvable:$true] %s28_s14 }
   0x8   :  { %s69_s29 = sshll.u32 %s1707_s28, 4  ;;  %s1708_s15 = smov 128   ;;  %s70_s29 = int_to_ptr.vmem [resolvable:$true] %s69_s29 }
   0x9   :  { %s1709_s16 = smov 8   ;;  %s46_s18 = sshll.u32 %s2107_s2, 4  ;;  %s47_s18 = int_to_ptr.hbm [resolvable:$true] %s46_s18 }
   0xa   :  { %75 = dma.hbm_to_vmem [thread:$0]  %s68_s27, 6144, %s70_s29, [#allocation13], %s1708_s15, %s1708_s15, %s1709_s16  }
   0xb   :  { %s1710_s4 = smov [#allocation4]   ;;  %s1711_s19 = smov [#allocation10]  }
   0xc   :  { %31 = dma.hbm_to_smem %s29_s14, 16, %s1710_s4, [#allocation7]  }
   0xd   :  { %49 = dma.hbm_to_smem %s47_s18, 32, %s1711_s19, [#allocation9]  }
   0xe   :  { %s54_s0 = sshll.u32 %s2108_s3, 4  ;;  %s1712_s22 = smov [#allocation11]   ;;  %s55_s0 = int_to_ptr.hbm [resolvable:$true] %s54_s0 }
   0xf   :  { %s56_s23 = sshll.u32 %s1712_s22, 4  ;;  %s86_s26 = sshll.u32 %s2113_s8, 4  ;;  %s57_s23 = int_to_ptr.vmem [resolvable:$true] %s56_s23  ;;  %s87_s26 = int_to_ptr.hbm [resolvable:$true] %s86_s26 }
  0x10   :  { %62 = dma.hbm_to_vmem [thread:$0]  %s55_s0, 256, %s57_s23, [#allocation5], %s1708_s15, %s1708_s15, %s1709_s16  }
  0x11   :  { %s1713_s2 = smov [#allocation14]   ;;  %s101_s30 = sshll.u32 %s2115_s10, 4  ;;  %s102_s30 = int_to_ptr.hbm [resolvable:$true] %s101_s30 }
  0x12   :  { %s88_s27 = sshll.u32 %s1713_s2, 4  ;;  %s1714_s3 = smov [#allocation15]   ;;  %s89_s27 = int_to_ptr.vmem [resolvable:$true] %s88_s27 }
  0x13   :  { %94 = dma.hbm_to_vmem [thread:$0]  %s87_s26, 2048, %s89_s27, [#allocation13], %s1708_s15, %s1708_s15, %s1709_s16  }
  0x14   :  { %s103_s13 = sshll.u32 %s1714_s3, 4  ;;  %s104_s13 = int_to_ptr.vmem [resolvable:$true] %s103_s13 }
  0x15   :  { %109 = dma.hbm_to_vmem [thread:$0]  %s102_s30, 2048, %s104_s13, [#allocation16], %s1708_s15, %s1708_s15, %s1709_s16  }
  0x16   :  { %1586 = dma.done.wait [#allocation7], 16  }
  0x17   :  { %1587 = vsyncadd [#allocation7], 4294967280 }
  0x18   :  { %1588 = dma.done.wait [#allocation9], 48  }
  0x19   :  { %1589 = vsyncadd [#allocation9], 4294967248 }
  0x1a   :  { %1590 = dma.done.wait [#allocation5], 256  }
  0x1b   :  { %1591 = vsyncadd [#allocation5], 4294967040 }
  0x1c   :  { %1592 = dma.done.wait [#allocation13], 8192  }
  0x1d   :  { %1593 = vsyncadd [#allocation13], 4294959104 }
  0x1e   :  { %1594 = dma.done.wait [#allocation16], 2048  }
  0x1f   :  { %1595 = vsyncadd [#allocation16], 4294965248 }
  0x20   :  { %140 = sfence }
  0x21   :  { %v1831_v0 = vld [vmem:[%s2111_s6] sm:$0x1]  ;;  %v145_v2 = vlaneseq  ;;  %v165_v3 = vld [vmem:[#allocation12 + $0x78] sm:$0xff]  ;;  %v163_v6 = vld [vmem:[#allocation12 + $0x68] sm:$0xff]  ;;  %v1715_v8 = vmov 0.0   ;;  %s1840_s6 = smov 0  }
  0x22   :  { %v1836_v1 = vld [vmem:[%s2112_s7] sm:$0x1]  ;;  %166 = vmatpush.msra.mxu0 %v165_v3  ;;  %v162_v7 = vld [vmem:[#allocation12 + $0x60] sm:$0xff]  ;;  %v161_v10 = vld [vmem:[#allocation12 + $0x58] sm:$0xff] }
  0x23   :  { %v164_v4 = vld [vmem:[#allocation12 + $0x70] sm:$0xff]  ;;  %v146_v5 = vand.u32 127, %v145_v2  ;;  %v159_v12 = vld [vmem:[#allocation12 + $0x48] sm:$0xff]  ;;  %v158_v13 = vld [vmem:[#allocation12 + $0x40] sm:$0xff] }
  0x24   :  { %167 = vmatpush.msra.mxu0 %v164_v4  ;;  %v160_v11 = vld [vmem:[#allocation12 + $0x50] sm:$0xff]  ;;  %v157_v14 = vld [vmem:[#allocation12 + $0x38] sm:$0xff]  ;;  %v155_v16 = vld [vmem:[#allocation12 + $0x28] sm:$0xff] }
  0x25   :  { %vm147_vm0 = vcmp.lt.s32.totalorder %v146_v5, 32  ;;  %v156_v15 = vld [vmem:[#allocation12 + $0x30] sm:$0xff]  ;;  %v154_v17 = vld [vmem:[#allocation12 + $0x20] sm:$0xff]  ;;  %v153_v18 = vld [vmem:[#allocation12 + $0x18] sm:$0xff] }
  0x26   :  { %v1838_v9 = vsel %vm147_vm0, 1.0, %v1715_v8  ;;  %168 = vmatpush.msra.mxu0 %v163_v6  ;;  %v152_v19 = vld [vmem:[#allocation12 + $0x10] sm:$0xff]  ;;  %v151_v20 = vld [vmem:[#allocation12 + $0x8] sm:$0xff]  ;;  %v150_v21 = vld [vmem:[#allocation12] sm:$0xff] }
  0x27   :  { %v141_v22 = vld [vmem:[#allocation11] sm:$0xff]  ;;  %v142_v23 = vld [vmem:[#allocation11 + $0x8] sm:$0xff] }
  0x28   :  { %169 = vmatpush.msra.mxu0 %v162_v7 }
  0x2a   :  { %170 = vmatpush.msra.mxu0 %v161_v10 }
  0x2c   :  { %171 = vmatpush.msra.mxu0 %v160_v11 }
  0x2e   :  { %172 = vmatpush.msra.mxu0 %v159_v12 }
  0x30   :  { %173 = vmatpush.msra.mxu0 %v158_v13 }
  0x32   :  { %174 = vmatpush.msra.mxu0 %v157_v14 }
  0x34   :  { %175 = vmatpush.msra.mxu0 %v156_v15 }
  0x36   :  { %176 = vmatpush.msra.mxu0 %v155_v16 }
  0x38   :  { %177 = vmatpush.msra.mxu0 %v154_v17 }
  0x3a   :  { %178 = vmatpush.msra.mxu0 %v153_v18 }
  0x3c   :  { %179 = vmatpush.msra.mxu0 %v152_v19 }
  0x3e   :  { %180 = vmatpush.msra.mxu0 %v151_v20 }
  0x40   :  { %181 = vmatpush.msra.mxu0 %v150_v21 }
  0x41   :  { %182 = vmatmul.f32.vlgmr.msra.gmra.mxu0 %v141_v22 }
  0x49   :  { %185 = vmatmul.f32.gmra.mxu0 %v142_v23 }
  0xbe   :  { %v183_v24 = vpop.f32.mrf.mxu0 }
  0xbf   :  { %189 = vst [vmem:[#allocation2] sm:$0xff] %v183_v24 }
  0xc6   :  { %v186_v25 = vpop.f32.mrf.mxu0 }
  0xc7   :  { %190 = vst [vmem:[#allocation2 + $0x8] sm:$0xff] %v186_v25 }
  0xc8 LB: > { %s1846_s7 = sld [smem:[#allocation4 + %s1600_s6]]   ;;  %s1849_s17 = sadd.s32 1, %s1600_s6   ;;  %v1610_v27 = vmov -1e+30   ;;  %s1600_s6 = sphi %s1840_s6, %s2118_s6  }
  0xc9   : > { %s1852_s18 = sld [smem:[#allocation4 + %s1849_s17]]  ;;  %s200_s4 = scalar_lea.vmem [#allocation2], %s1600_s6 }
  0xce   : > { %v1855_v26 = vld [vmem:[%s200_s4] sm:$0x1] }
  0xcf   : > { %p923_p0 = scmp.ge.s32.totalorder %s1846_s7, %s1852_s18 }
  0xd0   : > { %s1606_s19 = smov (!%p923_p0), %s1846_s7  }
  0xd1   : > { %925 = sbr.rel (%p923_p0) target bundleno = 341 (0x155), region = 169 }
  0xd6   : > { %v1602_v28 = vmov -1e+30  }
  0xd7 LB: >> { %s1716_s20 = smov 127   ;;  %s209_s21 = sld [smem:[#allocation8 + %s1608_s19]]  ;;  %s1608_s19 = sphi %s1606_s19, %s205_s19   ;;  %v1604_v28 = vphi %v1602_v28, %v1603_v28  }
  0xd8   : >> { %213 = vrot.lane.b32.xlu0 %v1855_v26, %s1716_s20  ;;  %s217_s0 = sld [smem:[#allocation10 + %s1608_s19]]  ;;  %s205_s19 = sadd.s32 1, %s1608_s19  }
  0xd9   : >> { %p204_p1 = scmp.ge.s32.totalorder %s205_s19, %s1852_s18 }
  0xdd   : >> { %s210_s22 = scalar_lea.vmem [#allocation2], %s209_s21 }
  0xde   : >> { %v211_v29 = vld [vmem:[%s210_s22] sm:$0x1]  ;;  %v218_v31 = vstv %s217_s0 }
 0x14a   : >> { %v214_v30 = vpop.permute.xlu0 %213 }
 0x14b   : >> { %v216_v32 = vadd.f32 %v214_v30, %v211_v29 }
 0x14d   : >> { %v219_v33 = vadd.f32 %v218_v31, %v216_v32 }
 0x14f   : >> { %vm220_vm1 = vcmp.gt.f32.partialorder %v219_v33, 0.0  ;;  %v221_v34 = vmul.f32 0.2, %v219_v33 }
 0x150   : > { %207 = sbr.rel (!%p204_p1) target bundleno = 215 (0xd7), region = 175 }
 0x151   : >> { %v222_v35 = vsel %vm220_vm1, %v219_v33, %v221_v34 }
 0x152   : >> { %v223_v36 = vmax.f32 %v1604_v28, %v222_v35  }
 0x154   : >> { %v1603_v28 = vmov %v223_v36   ;;  %v1611_v27 = vmov (%p204_p1), %v223_v36  }
 0x155 PF: > { %v1626_v37 = vmov 0.0   ;;  %v1630_v38 = vmov 0.0   ;;  %934 = sbr.rel (%p923_p0) target bundleno = 601 (0x259), region = 180  ;;  %v1612_v27 = vphi %v1610_v27, %v1611_v27  }
 0x15a   : > { %v1614_v39 = vmov 0.0   ;;  %v1618_v40 = vmov 0.0  }
 0x15b LB: >> { %s1717_s23 = smov 127   ;;  %v1718_v41 = vmov 32   ;;  %s232_s24 = sld [smem:[#allocation8 + %s1624_s7]]  ;;  %s1624_s7 = sphi %s1846_s7, %s227_s7   ;;  %v1620_v40 = vphi %v1618_v40, %v1619_v40   ;;  %v1616_v39 = vphi %v1614_v39, %v1615_v39  }
 0x15c   : >> { %236 = vrot.lane.b32.xlu0 %v1855_v26, %s1717_s23  ;;  %s240_s25 = sld [smem:[#allocation10 + %s1624_s7]]  ;;  %s227_s7 = sadd.s32 1, %s1624_s7  }
 0x15d   : >> { %1279 = vset.pattern.permute.xlu0 %v1718_v41  ;;  %p226_p2 = scmp.ge.s32.totalorder %s227_s7, %s1852_s18 }
 0x161   : >> { %s233_s26 = scalar_lea.vmem [#allocation2], %s232_s24 }
 0x162   : >> { %v234_v42 = vld [vmem:[%s233_s26] sm:$0x1]  ;;  %v241_v44 = vstv %s240_s25 }
 0x1ce   : >> { %v237_v43 = vpop.permute.xlu0 %236 }
 0x1cf   : >> { %v239_v45 = vadd.f32 %v237_v43, %v234_v42 }
 0x1d1   : >> { %v242_v46 = vadd.f32 %v241_v44, %v239_v45 }
 0x1d3   : >> { %vm243_vm2 = vcmp.gt.f32.partialorder %v242_v46, 0.0  ;;  %v244_v47 = vmul.f32 0.2, %v242_v46 }
 0x1d5   : >> { %v245_v48 = vsel %vm243_vm2, %v242_v46, %v244_v47 }
 0x1d6   : >> { %v246_v49 = vsub.f32 %v245_v48, %v1612_v27 }
 0x1d8   : >> { %v247_v50 = vmul.f32 1.442695, %v246_v49 }
 0x1da   : >> { %1280 = vpow2.f32 %v247_v50 }
 0x1e0   : >> { %v1281_v51 = vpop.eup %1280 }
 0x1e1   : >> { %v249_v52 = vadd.f32 %v1620_v40, %v1281_v51   ;;  %252 = vperm.xlu0 %1279, %v1281_v51  }
 0x1e3   : >> { %v1619_v40 = vmov %v249_v52   ;;  %v1631_v38 = vmov (%p226_p2), %v249_v52  }
 0x253   : >> { %v253_v53 = vpop.permute.xlu0 %252 }
 0x254   : >> { %v255_v54 = vmul.f32 %v253_v53, %v234_v42  ;;  %229 = sbr.rel (!%p226_p2) target bundleno = 347 (0x15b), region = 186 }
 0x256   : >> { %v256_v55 = vadd.f32 %v1616_v39, %v255_v54  }
 0x258   : >> { %v1615_v39 = vmov %v256_v55   ;;  %v1627_v37 = vmov (%p226_p2), %v256_v55  }
 0x259 PF: > { %v257_v56 = vadd.f32 1e-16, %v1632_v38  ;;  %v1719_v57 = vmov 32   ;;  %s265_s2 = scalar_lea.vmem [#allocation3], %s1600_s6  ;;  %p193_p3 = scmp.ge.s32.totalorder %s1849_s17, 16   ;;  %v1632_v38 = vphi %v1630_v38, %v1631_v38   ;;  %v1628_v37 = vphi %v1626_v37, %v1627_v37  }
 0x25a   : > { %1282 = vset.pattern.permute.xlu0 %v1719_v57  ;;  %s2118_s6 = smov %s1849_s17  ;;  %v1285_v63 = vld [vmem:[%s2110_s5] ss:$0 sm:$0xff] (%p193_p3)  ;;  %s1720_s14 = smov (%p193_p3), 0.0   ;;  %v369_v36 = vld [vmem:[#allocation12 + $0xf8] sm:$0xff] (%p193_p3)  ;;  %v367_v38 = vld [vmem:[#allocation12 + $0xe8] sm:$0xff] (%p193_p3) }
 0x25b   : > { %1283 = vrcp.f32 %v257_v56  ;;  %370 = vmatpush.msra.mxu1 (%p193_p3), %v369_v36  ;;  %v366_v39 = vld [vmem:[#allocation12 + $0xe0] sm:$0xff] (%p193_p3)  ;;  %v365_v40 = vld [vmem:[#allocation12 + $0xd8] sm:$0xff] (%p193_p3)  ;;  %v364_v41 = vld [vmem:[#allocation12 + $0xd0] sm:$0xff] (%p193_p3)  ;;  %s1929_s18 = smov (%p193_p3), 0  }
 0x25c   :  { %v363_v42 = vld [vmem:[#allocation12 + $0xc8] sm:$0xff] (%p193_p3)  ;;  %v362_v43 = vld [vmem:[#allocation12 + $0xc0] sm:$0xff] (%p193_p3)  ;;  %v361_v45 = vld [vmem:[#allocation12 + $0xb8] sm:$0xff] (%p193_p3) }
 0x25d   :  { %v360_v46 = vld [vmem:[#allocation12 + $0xb0] sm:$0xff] (%p193_p3)  ;;  %v359_v47 = vld [vmem:[#allocation12 + $0xa8] sm:$0xff] (%p193_p3) }
 0x261   : > { %v1284_v58 = vpop.eup %1283 }
 0x262   : > { %261 = vperm.xlu0 %1282, %v1284_v58   ;;  %v358_v58 = vld [vmem:[#allocation12 + $0xa0] sm:$0xff] (%p193_p3) }
 0x2d3   :  { %195 = sbr.rel (!%p193_p3) target bundleno = 200 (0xc8), region = 197 }
 0x2d4   : > { %v262_v59 = vpop.permute.xlu0 %261 }
 0x2d5   : > { %v264_v60 = vmul.f32 %v1628_v37, %v262_v59  ;;  %v368_v37 = vld [vmem:[#allocation12 + $0xf0] sm:$0xff] (%p193_p3)  ;;  %v357_v59 = vld [vmem:[#allocation12 + $0x98] sm:$0xff] (%p193_p3) }
 0x2d6   :  { %371 = vmatpush.msra.mxu1 (%p193_p3), %v368_v37 }
 0x2d7   : > { %266 = vst [vmem:[%s265_s2] sm:$0x1] %v264_v60  ;;  %v356_v60 = vld [vmem:[#allocation12 + $0x90] sm:$0xff] (%p193_p3) }
 0x2d8   :  { %372 = vmatpush.msra.mxu1 %v367_v38 }
 0x2da   :  { %373 = vmatpush.msra.mxu1 %v366_v39 }
 0x2dc   :  { %374 = vmatpush.msra.mxu1 %v365_v40 }
 0x2de   :  { %v267_v61 = vld [vmem:[#allocation3] sm:$0xff]  ;;  %v268_v62 = vld [vmem:[#allocation3 + $0x8] sm:$0xff]  ;;  %375 = vmatpush.msra.mxu1 %v364_v41 }
 0x2df   :  { %v273_v2 = vadd.f32 %v1285_v63, %v267_v61  ;;  %v274_v3 = vadd.f32 %v1285_v63, %v268_v62  ;;  %v355_v61 = vld [vmem:[#allocation12 + $0x88] sm:$0xff]  ;;  %v354_v62 = vld [vmem:[#allocation12 + $0x80] sm:$0xff] }
 0x2e0   :  { %376 = vmatpush.msra.mxu1 %v363_v42 }
 0x2e1   :  { %v1890_v4 = vmul.f32 %v1838_v9, %v273_v2  ;;  %v1893_v5 = vmul.f32 %v1838_v9, %v274_v3  ;;  %v1909_v3 = vperm.slane %v1831_v0, 0 }
 0x2e2   :  { %377 = vmatpush.msra.mxu1 %v362_v43 }
 0x2e3   :  { %v277_v6 = vadd.f32 %v1893_v5, %v1890_v4  ;;  %v287_v7 = vmul.f32 %v1890_v4, %v1890_v4  ;;  %v288_v8 = vmul.f32 %v1893_v5, %v1893_v5 }
 0x2e4   :  { %378 = vmatpush.msra.mxu1 %v361_v45 }
 0x2e5   :  { %278 = vadd.xlane.f32.xlu0 %v277_v6  ;;  %v289_v10 = vadd.f32 %v288_v8, %v287_v7 }
 0x2e6   :  { %379 = vmatpush.msra.mxu1 %v360_v46 }
 0x2e8   :  { %380 = vmatpush.msra.mxu1 %v359_v47 }
 0x2ea   :  { %381 = vmatpush.msra.mxu1 %v358_v58 }
 0x2ec   :  { %382 = vmatpush.msra.mxu1 %v357_v59 }
 0x2ed   :  { %290 = vadd.xlane.f32.xlu0 %v289_v10  ;;  %v1913_v10 = vperm.slane %v1836_v1, 0 }
 0x2ee   :  { %383 = vmatpush.msra.mxu1 %v356_v60 }
 0x2f0   :  { %384 = vmatpush.msra.mxu1 %v355_v61 }
 0x2f2   :  { %385 = vmatpush.msra.mxu1 %v354_v62 }
 0x358   :  { %v279_v11 = vpop.xlane.xlu0 %278 }
 0x359   :  { %v280_v12 = vrot.slane %v279_v11, 4 }
 0x35b   :  { %v281_v13 = vadd.f32 %v280_v12, %v279_v11 }
 0x35d   :  { %v282_v14 = vrot.slane %v281_v13, 2 }
 0x35f   :  { %v283_v15 = vadd.f32 %v282_v14, %v281_v13 }
 0x360   :  { %v291_v16 = vpop.xlane.xlu0 %290 }
 0x361   :  { %v292_v17 = vrot.slane %v291_v16, 4  ;;  %v284_v18 = vrot.slane %v283_v15, 1 }
 0x363   :  { %v293_v19 = vadd.f32 %v292_v17, %v291_v16  ;;  %v285_v20 = vadd.f32 %v284_v18, %v283_v15 }
 0x365   :  { %v294_v21 = vrot.slane %v293_v19, 2  ;;  %1015 = vpush %v285_v20 }
 0x367   :  { %v295_v22 = vadd.f32 %v294_v21, %v293_v19 }
 0x369   :  { %v296_v23 = vrot.slane %v295_v22, 1 }
 0x36b   :  { %v297_v24 = vadd.f32 %v296_v23, %v295_v22 }
 0x36d   :  { %1017 = vpush %v297_v24 }
 0x396   :  { %s1016_s29 = spop %1015 }
 0x397   :  { %s1901_s30 = smul.f32 0.001953125, %s1016_s29 }
 0x399   :  { %s301_s3 = smul.f32 %s1901_s30, %s1901_s30  ;;  %v304_v63 = vstv %s1901_s30 }
 0x39a   :  { %v305_v2 = vsub.f32 %v1890_v4, %v304_v63  ;;  %v306_v7 = vsub.f32 %v1893_v5, %v304_v63 }
 0x39e   :  { %s1018_s13 = spop %1017 }
 0x39f   :  { %s300_s8 = smul.f32 0.001953125, %s1018_s13 }
 0x3a1   :  { %s302_s10 = ssub.f32 %s300_s8, %s301_s3 }
 0x3a3   :  { %s303_s1 = smax.f32 %s1720_s14, %s302_s10 }
 0x3a4   :  { %v307_v25 = vstv %s303_s1 }
 0x3a5   :  { %1286 = vrsqrt.f32 %v307_v25  ;;  %vm315_vm3 = vcmp.eq.f32.partialorder %v307_v25, inf  ;;  %v318_v33 = vand.u32 2147483648, %v307_v25  ;;  %vm317_vm4 = vcmp.eq.f32.partialorder %v307_v25, 0.0 }
 0x3ab   :  { %v1287_v26 = vpop.eup %1286 }
 0x3ac   :  { %v309_v27 = vmul.f32 %v1287_v26, %v307_v25 }
 0x3ae   :  { %v310_v28 = vmul.f32 %v1287_v26, %v309_v27 }
 0x3b0   :  { %v311_v29 = vmul.f32 0.5, %v310_v28 }
 0x3b2   :  { %v312_v30 = vsub.f32 1.5, %v311_v29 }
 0x3b4   :  { %v313_v31 = vmul.f32 %v1287_v26, %v312_v30 }
 0x3b6   :  { %v314_v32 = vmul.f32 %v313_v31, %v307_v25 }
 0x3b8   :  { %v316_v34 = vsel %vm315_vm3, %v307_v25, %v314_v32 }
 0x3b9   :  { %v319_v35 = vsel %vm317_vm4, %v318_v33, %v316_v34 }
 0x3ba   :  { %1019 = vpush %v319_v35 }
 0x3eb   :  { %s1020_s6 = spop %1019 }
 0x3ec   :  { %s321_s7 = sadd.f32 1e-05, %s1020_s6 }
 0x3ee   :  { %v322_v44 = vstv %s321_s7 }
 0x3ef   :  { %1288 = vrcp.f32 %v322_v44  ;;  %v334_v51 = vand.u32 2147483648, %v322_v44  ;;  %v332_v53 = vand.u32 2147483647, %v322_v44  ;;  %vm328_vm6 = vweird.f32 %v322_v44 }
 0x3f1   :  { %v335_v55 = vor.u32 1.1754944e-38, %v334_v51  ;;  %vm333_vm8 = vcmp.eq.f32.partialorder %v332_v53, 8.507059e+37 }
 0x3f5   :  { %v1289_v48 = vpop.eup %1288 }
 0x3f6   :  { %v324_v49 = vmul.f32 %v1289_v48, %v322_v44  ;;  %vm329_vm5 = vweird.f32 %v1289_v48 }
 0x3f7   :  { %vm330_vm7 = vmor %vm328_vm6, %vm329_vm5 }
 0x3f8   :  { %v325_v50 = vsub.f32 1.0, %v324_v49 }
 0x3fa   :  { %v326_v52 = vmul.f32 %v1289_v48, %v325_v50 }
 0x3fc   :  { %v327_v54 = vadd.f32 %v1289_v48, %v326_v52 }
 0x3fe   :  { %v331_v56 = vsel %vm330_vm7, %v1289_v48, %v327_v54 }
 0x3ff   :  { %v336_v57 = vsel %vm333_vm8, %v335_v55, %v331_v56 }
 0x400   :  { %1021 = vpush %v336_v57 }
 0x431   :  { %s1022_s17 = spop %1021 }
 0x432   :  { %v338_v6 = vstv %s1022_s17 }
 0x433   :  { %v339_v8 = vmul.f32 %v338_v6, %v305_v2  ;;  %v340_v11 = vmul.f32 %v338_v6, %v306_v7 }
 0x435   :  { %v344_v12 = vmul.f32 %v1909_v3, %v339_v8  ;;  %v345_v14 = vmul.f32 %v1909_v3, %v340_v11 }
 0x437   :  { %v1917_v13 = vadd.f32 %v1913_v10, %v344_v12  ;;  %v1924_v0 = vadd.f32 %v1913_v10, %v345_v14 }
 0x439   :  { %v351_v4 = vmax.f32 %v1917_v13, 0.0  ;;  %v352_v5 = vmax.f32 %v1924_v0, 0.0 }
 0x43b   :  { %386 = vmatmul.f32.vlgmr.msra.gmra.mxu1 %v351_v4 }
 0x443   :  { %389 = vmatmul.f32.gmra.mxu1 %v352_v5 }
 0x4b8   :  { %v387_v1 = vpop.f32.mrf.mxu1 }
 0x4b9   :  { %393 = vst [vmem:[#allocation2] sm:$0xff] %v387_v1 }
 0x4c0   :  { %v390_v15 = vpop.f32.mrf.mxu1 }
 0x4c1   :  { %394 = vst [vmem:[#allocation2 + $0x8] sm:$0xff] %v390_v15 }
 0x4c2 LB: > { %s1935_s4 = sld [smem:[#allocation4 + %s1636_s18]]   ;;  %s1938_s19 = sadd.s32 1, %s1636_s18   ;;  %v1646_v17 = vmov -1e+30   ;;  %s1636_s18 = sphi %s1929_s18, %s2119_s18  }
 0x4c3   : > { %s1941_s20 = sld [smem:[#allocation4 + %s1938_s19]]  ;;  %s404_s21 = scalar_lea.vmem [#allocation2], %s1636_s18 }
 0x4c8   : > { %v1944_v16 = vld [vmem:[%s404_s21] sm:$0x1] }
 0x4c9   : > { %p947_p4 = scmp.ge.s32.totalorder %s1935_s4, %s1941_s20 }
 0x4ca   : > { %s1642_s0 = smov (!%p947_p4), %s1935_s4  }
 0x4cb   : > { %949 = sbr.rel (%p947_p4) target bundleno = 1359 (0x54f), region = 202 }
 0x4d0   : > { %v1638_v18 = vmov -1e+30  }
 0x4d1 LB: >> { %s1721_s22 = smov 127   ;;  %s413_s23 = sld [smem:[#allocation8 + %s1644_s0]]  ;;  %s1644_s0 = sphi %s1642_s0, %s409_s0   ;;  %v1640_v18 = vphi %v1638_v18, %v1639_v18  }
 0x4d2   : >> { %417 = vrot.lane.b32.xlu0 %v1944_v16, %s1721_s22  ;;  %s421_s24 = sadd.s32 64, %s1644_s0  ;;  %s409_s0 = sadd.s32 1, %s1644_s0  }
 0x4d3   : >> { %s422_s25 = sld [smem:[#allocation10 + %s421_s24]]  ;;  %p408_p5 = scmp.ge.s32.totalorder %s409_s0, %s1941_s20 }
 0x4d7   : >> { %s414_s26 = scalar_lea.vmem [#allocation2], %s413_s23 }
 0x4d8   : >> { %v415_v19 = vld [vmem:[%s414_s26] sm:$0x1] }
 0x4d9   : >> { %v423_v21 = vstv %s422_s25 }
 0x544   : >> { %v418_v20 = vpop.permute.xlu0 %417 }
 0x545   : >> { %v420_v22 = vadd.f32 %v418_v20, %v415_v19 }
 0x547   : >> { %v424_v23 = vadd.f32 %v423_v21, %v420_v22 }
 0x549   : >> { %vm425_vm9 = vcmp.gt.f32.partialorder %v424_v23, 0.0  ;;  %v426_v24 = vmul.f32 0.2, %v424_v23 }
 0x54a   : > { %411 = sbr.rel (!%p408_p5) target bundleno = 1233 (0x4d1), region = 208 }
 0x54b   : >> { %v427_v25 = vsel %vm425_vm9, %v424_v23, %v426_v24 }
 0x54c   : >> { %v428_v26 = vmax.f32 %v1640_v18, %v427_v25  }
 0x54e   : >> { %v1639_v18 = vmov %v428_v26   ;;  %v1647_v17 = vmov (%p408_p5), %v428_v26  }
 0x54f PF: > { %v1662_v27 = vmov 0.0   ;;  %v1666_v28 = vmov 0.0   ;;  %958 = sbr.rel (%p947_p4) target bundleno = 1619 (0x653), region = 213  ;;  %v1648_v17 = vphi %v1646_v17, %v1647_v17  }
 0x554   : > { %v1650_v29 = vmov 0.0   ;;  %v1654_v30 = vmov 0.0  }
 0x555 LB: >> { %s1722_s2 = smov 127   ;;  %v1723_v31 = vmov 32   ;;  %s437_s27 = sld [smem:[#allocation8 + %s1660_s4]]  ;;  %s1660_s4 = sphi %s1935_s4, %s432_s4   ;;  %v1656_v30 = vphi %v1654_v30, %v1655_v30   ;;  %v1652_v29 = vphi %v1650_v29, %v1651_v29  }
 0x556   : >> { %441 = vrot.lane.b32.xlu0 %v1944_v16, %s1722_s2  ;;  %s445_s28 = sadd.s32 64, %s1660_s4  ;;  %s432_s4 = sadd.s32 1, %s1660_s4  }
 0x557   : >> { %1290 = vset.pattern.permute.xlu0 %v1723_v31  ;;  %s446_s29 = sld [smem:[#allocation10 + %s445_s28]]  ;;  %p431_p6 = scmp.ge.s32.totalorder %s432_s4, %s1941_s20 }
 0x55b   : >> { %s438_s30 = scalar_lea.vmem [#allocation2], %s437_s27 }
 0x55c   : >> { %v439_v32 = vld [vmem:[%s438_s30] sm:$0x1] }
 0x55d   : >> { %v447_v34 = vstv %s446_s29 }
 0x5c8   : >> { %v442_v33 = vpop.permute.xlu0 %441 }
 0x5c9   : >> { %v444_v35 = vadd.f32 %v442_v33, %v439_v32 }
 0x5cb   : >> { %v448_v36 = vadd.f32 %v447_v34, %v444_v35 }
 0x5cd   : >> { %vm449_vm10 = vcmp.gt.f32.partialorder %v448_v36, 0.0  ;;  %v450_v37 = vmul.f32 0.2, %v448_v36 }
 0x5cf   : >> { %v451_v38 = vsel %vm449_vm10, %v448_v36, %v450_v37 }
 0x5d0   : >> { %v452_v39 = vsub.f32 %v451_v38, %v1648_v17 }
 0x5d2   : >> { %v453_v40 = vmul.f32 1.442695, %v452_v39 }
 0x5d4   : >> { %1291 = vpow2.f32 %v453_v40 }
 0x5da   : >> { %v1292_v41 = vpop.eup %1291 }
 0x5db   : >> { %v455_v42 = vadd.f32 %v1656_v30, %v1292_v41   ;;  %458 = vperm.xlu0 %1290, %v1292_v41  }
 0x5dd   : >> { %v1655_v30 = vmov %v455_v42   ;;  %v1667_v28 = vmov (%p431_p6), %v455_v42  }
 0x64d   : >> { %v459_v43 = vpop.permute.xlu0 %458 }
 0x64e   : >> { %v461_v44 = vmul.f32 %v459_v43, %v439_v32  ;;  %434 = sbr.rel (!%p431_p6) target bundleno = 1365 (0x555), region = 219 }
 0x650   : >> { %v462_v45 = vadd.f32 %v1652_v29, %v461_v44  }
 0x652   : >> { %v1651_v29 = vmov %v462_v45   ;;  %v1663_v27 = vmov (%p431_p6), %v462_v45  }
 0x653 PF: > { %v463_v46 = vadd.f32 1e-16, %v1668_v28  ;;  %v1724_v47 = vmov 32   ;;  %s471_s3 = scalar_lea.vmem [#allocation3], %s1636_s18  ;;  %p397_p7 = scmp.ge.s32.totalorder %s1938_s19, 16   ;;  %v1668_v28 = vphi %v1666_v28, %v1667_v28   ;;  %v1664_v27 = vphi %v1662_v27, %v1663_v27  }
 0x654   : > { %1293 = vset.pattern.permute.xlu0 %v1724_v47  ;;  %s2119_s18 = smov %s1938_s19  ;;  %v1296_v53 = vld [vmem:[%s2110_s5 + $0x1] ss:$0 sm:$0xff] (%p397_p7)  ;;  %v572_v28 = vld [vmem:[#allocation12 + $0x178] sm:$0xff] (%p397_p7)  ;;  %v570_v30 = vld [vmem:[#allocation12 + $0x168] sm:$0xff] (%p397_p7)  ;;  %s2016_s0 = smov (%p397_p7), 0  }
 0x655   : > { %1294 = vrcp.f32 %v463_v46  ;;  %v571_v29 = vld [vmem:[#allocation12 + $0x170] sm:$0xff] (%p397_p7)  ;;  %573 = vmatpush.msra.mxu2 (%p397_p7), %v572_v28  ;;  %v569_v31 = vld [vmem:[#allocation12 + $0x160] sm:$0xff] (%p397_p7)  ;;  %v568_v32 = vld [vmem:[#allocation12 + $0x158] sm:$0xff] (%p397_p7) }
 0x656   :  { %v567_v33 = vld [vmem:[#allocation12 + $0x150] sm:$0xff] (%p397_p7)  ;;  %v566_v34 = vld [vmem:[#allocation12 + $0x148] sm:$0xff] (%p397_p7)  ;;  %v565_v35 = vld [vmem:[#allocation12 + $0x140] sm:$0xff] (%p397_p7) }
 0x657   :  { %574 = vmatpush.msra.mxu2 (%p397_p7), %v571_v29  ;;  %v564_v37 = vld [vmem:[#allocation12 + $0x138] sm:$0xff] (%p397_p7)  ;;  %v563_v38 = vld [vmem:[#allocation12 + $0x130] sm:$0xff] (%p397_p7)  ;;  %v562_v39 = vld [vmem:[#allocation12 + $0x128] sm:$0xff] (%p397_p7) }
 0x659   :  { %575 = vmatpush.msra.mxu2 (%p397_p7), %v570_v30 }
 0x65b   : > { %v1295_v48 = vpop.eup %1294  ;;  %576 = vmatpush.msra.mxu2 (%p397_p7), %v569_v31 }
 0x65c   : > { %467 = vperm.xlu0 %1293, %v1295_v48  }
 0x65d   :  { %577 = vmatpush.msra.mxu2 (%p397_p7), %v568_v32 }
 0x65f   :  { %578 = vmatpush.msra.mxu2 (%p397_p7), %v567_v33 }
 0x661   :  { %579 = vmatpush.msra.mxu2 (%p397_p7), %v566_v34 }
 0x663   :  { %580 = vmatpush.msra.mxu2 (%p397_p7), %v565_v35 }
 0x665   :  { %581 = vmatpush.msra.mxu2 (%p397_p7), %v564_v37 }
 0x667   :  { %582 = vmatpush.msra.mxu2 (%p397_p7), %v563_v38 }
 0x669   :  { %583 = vmatpush.msra.mxu2 (%p397_p7), %v562_v39 }
 0x6cd   :  { %399 = sbr.rel (!%p397_p7) target bundleno = 1218 (0x4c2), region = 230 }
 0x6ce   : > { %v468_v49 = vpop.permute.xlu0 %467 }
 0x6cf   : > { %v470_v50 = vmul.f32 %v1664_v27, %v468_v49 }
 0x6d1   : > { %472 = vst [vmem:[%s471_s3] sm:$0x1] %v470_v50  ;;  %v561_v50 = vld [vmem:[#allocation12 + $0x120] sm:$0xff] (%p397_p7) }
 0x6d2   :  { %584 = vmatpush.msra.mxu2 %v561_v50 }
 0x6d8   :  { %v473_v51 = vld [vmem:[#allocation3] sm:$0xff]  ;;  %v474_v52 = vld [vmem:[#allocation3 + $0x8] sm:$0xff] }
 0x6d9   :  { %v480_v54 = vadd.f32 %v1296_v53, %v473_v51  ;;  %v481_v55 = vadd.f32 %v1296_v53, %v474_v52  ;;  %v560_v51 = vld [vmem:[#allocation12 + $0x118] sm:$0xff]  ;;  %v559_v52 = vld [vmem:[#allocation12 + $0x110] sm:$0xff]  ;;  %v558_v53 = vld [vmem:[#allocation12 + $0x108] sm:$0xff] }
 0x6da   :  { %585 = vmatpush.msra.mxu2 %v560_v51 }
 0x6db   :  { %v482_v56 = vadd.f32 %v480_v54, %v351_v4  ;;  %v483_v57 = vadd.f32 %v481_v55, %v352_v5  ;;  %v557_v54 = vld [vmem:[#allocation12 + $0x100] sm:$0xff] }
 0x6dc   :  { %586 = vmatpush.msra.mxu2 %v559_v52 }
 0x6dd   :  { %v1983_v58 = vmul.f32 %v1838_v9, %v482_v56  ;;  %v1986_v59 = vmul.f32 %v1838_v9, %v483_v57 }
 0x6de   :  { %587 = vmatpush.msra.mxu2 %v558_v53 }
 0x6df   :  { %v486_v60 = vadd.f32 %v1986_v59, %v1983_v58  ;;  %v496_v61 = vmul.f32 %v1983_v58, %v1983_v58  ;;  %v497_v62 = vmul.f32 %v1986_v59, %v1986_v59 }
 0x6e0   :  { %588 = vmatpush.msra.mxu2 %v557_v54 }
 0x6e1   :  { %487 = vadd.xlane.f32.xlu0 %v486_v60  ;;  %v498_v63 = vadd.f32 %v497_v62, %v496_v61 }
 0x6e9   :  { %499 = vadd.xlane.f32.xlu0 %v498_v63 }
 0x754   :  { %v488_v2 = vpop.xlane.xlu0 %487 }
 0x755   :  { %v489_v6 = vrot.slane %v488_v2, 4 }
 0x757   :  { %v490_v7 = vadd.f32 %v489_v6, %v488_v2 }
 0x759   :  { %v491_v8 = vrot.slane %v490_v7, 2 }
 0x75b   :  { %v492_v11 = vadd.f32 %v491_v8, %v490_v7 }
 0x75c   :  { %v500_v12 = vpop.xlane.xlu0 %499 }
 0x75d   :  { %v501_v13 = vrot.slane %v500_v12, 4  ;;  %v493_v14 = vrot.slane %v492_v11, 1 }
 0x75f   :  { %v502_v4 = vadd.f32 %v501_v13, %v500_v12  ;;  %v494_v0 = vadd.f32 %v493_v14, %v492_v11 }
 0x761   :  { %v503_v5 = vrot.slane %v502_v4, 2  ;;  %1023 = vpush %v494_v0 }
 0x763   :  { %v504_v1 = vadd.f32 %v503_v5, %v502_v4 }
 0x765   :  { %v505_v15 = vrot.slane %v504_v1, 1 }
 0x767   :  { %v506_v16 = vadd.f32 %v505_v15, %v504_v1 }
 0x769   :  { %1025 = vpush %v506_v16 }
 0x792   :  { %s1024_s10 = spop %1023 }
 0x793   :  { %s1994_s1 = smul.f32 0.001953125, %s1024_s10 }
 0x795   :  { %s510_s6 = smul.f32 %s1994_s1, %s1994_s1  ;;  %v513_v55 = vstv %s1994_s1 }
 0x796   :  { %v514_v56 = vsub.f32 %v1983_v58, %v513_v55  ;;  %v515_v60 = vsub.f32 %v1986_v59, %v513_v55 }
 0x79a   :  { %s1026_s7 = spop %1025 }
 0x79b   :  { %s509_s17 = smul.f32 0.001953125, %s1026_s7 }
 0x79d   :  { %s511_s18 = ssub.f32 %s509_s17, %s510_s6 }
 0x79f   :  { %s512_s4 = smax.f32 %s1720_s14, %s511_s18 }
 0x7a0   :  { %v516_v17 = vstv %s512_s4 }
 0x7a1   :  { %1297 = vrsqrt.f32 %v516_v17  ;;  %vm524_vm11 = vcmp.eq.f32.partialorder %v516_v17, inf  ;;  %v527_v25 = vand.u32 2147483648, %v516_v17  ;;  %vm526_vm12 = vcmp.eq.f32.partialorder %v516_v17, 0.0 }
 0x7a7   :  { %v1298_v18 = vpop.eup %1297 }
 0x7a8   :  { %v518_v19 = vmul.f32 %v1298_v18, %v516_v17 }
 0x7aa   :  { %v519_v20 = vmul.f32 %v1298_v18, %v518_v19 }
 0x7ac   :  { %v520_v21 = vmul.f32 0.5, %v519_v20 }
 0x7ae   :  { %v521_v22 = vsub.f32 1.5, %v520_v21 }
 0x7b0   :  { %v522_v23 = vmul.f32 %v1298_v18, %v521_v22 }
 0x7b2   :  { %v523_v24 = vmul.f32 %v522_v23, %v516_v17 }
 0x7b4   :  { %v525_v26 = vsel %vm524_vm11, %v516_v17, %v523_v24 }
 0x7b5   :  { %v528_v27 = vsel %vm526_vm12, %v527_v25, %v525_v26 }
 0x7b6   :  { %1027 = vpush %v528_v27 }
 0x7e7   :  { %s1028_s19 = spop %1027 }
 0x7e8   :  { %s530_s20 = sadd.f32 1e-05, %s1028_s19 }
 0x7ea   :  { %v531_v36 = vstv %s530_s20 }
 0x7eb   :  { %1299 = vrcp.f32 %v531_v36  ;;  %v543_v43 = vand.u32 2147483648, %v531_v36  ;;  %v541_v45 = vand.u32 2147483647, %v531_v36  ;;  %vm537_vm14 = vweird.f32 %v531_v36 }
 0x7ed   :  { %v544_v47 = vor.u32 1.1754944e-38, %v543_v43  ;;  %vm542_vm0 = vcmp.eq.f32.partialorder %v541_v45, 8.507059e+37 }
 0x7f1   :  { %v1300_v40 = vpop.eup %1299 }
 0x7f2   :  { %v533_v41 = vmul.f32 %v1300_v40, %v531_v36  ;;  %vm538_vm13 = vweird.f32 %v1300_v40 }
 0x7f3   :  { %vm539_vm15 = vmor %vm537_vm14, %vm538_vm13 }
 0x7f4   :  { %v534_v42 = vsub.f32 1.0, %v533_v41 }
 0x7f6   :  { %v535_v44 = vmul.f32 %v1300_v40, %v534_v42 }
 0x7f8   :  { %v536_v46 = vadd.f32 %v1300_v40, %v535_v44 }
 0x7fa   :  { %v540_v48 = vsel %vm539_vm15, %v1300_v40, %v536_v46 }
 0x7fb   :  { %v545_v49 = vsel %vm542_vm0, %v544_v47, %v540_v48 }
 0x7fc   :  { %1029 = vpush %v545_v49 }
 0x82d   :  { %s1030_s21 = spop %1029 }
 0x82e   :  { %v547_v57 = vstv %s1030_s21 }
 0x82f   :  { %v548_v61 = vmul.f32 %v547_v57, %v514_v56  ;;  %v549_v62 = vmul.f32 %v547_v57, %v515_v60 }
 0x831   :  { %v550_v63 = vmul.f32 %v548_v61, %v1909_v3  ;;  %v551_v6 = vmul.f32 %v549_v62, %v1909_v3 }
 0x833   :  { %v2004_v2 = vadd.f32 %v550_v63, %v1913_v10  ;;  %v2011_v58 = vadd.f32 %v551_v6, %v1913_v10 }
 0x835   :  { %v554_v7 = vmax.f32 %v2004_v2, 0.0  ;;  %v555_v8 = vmax.f32 %v2011_v58, 0.0 }
 0x837   :  { %589 = vmatmul.f32.vlgmr.msra.gmra.mxu2 %v554_v7 }
 0x83f   :  { %592 = vmatmul.f32.gmra.mxu2 %v555_v8 }
 0x8ba   :  { %v590_v59 = vpop.f32.mrf.mxu2 }
 0x8bb   :  { %596 = vst [vmem:[#allocation2] sm:$0xff] %v590_v59 }
 0x8c2   :  { %v593_v11 = vpop.f32.mrf.mxu2 }
 0x8c3   :  { %597 = vst [vmem:[#allocation2 + $0x8] sm:$0xff] %v593_v11 }
 0x8c4 LB: > { %s2022_s22 = sld [smem:[#allocation4 + %s1672_s0]]   ;;  %s2025_s23 = sadd.s32 1, %s1672_s0   ;;  %v1682_v13 = vmov -1e+30   ;;  %s1672_s0 = sphi %s2016_s0, %s2120_s0  }
 0x8c5   : > { %s2028_s24 = sld [smem:[#allocation4 + %s2025_s23]]  ;;  %s607_s25 = scalar_lea.vmem [#allocation2], %s1672_s0 }
 0x8ca   : > { %v2031_v12 = vld [vmem:[%s607_s25] sm:$0x1] }
 0x8cb   : > { %p971_p8 = scmp.ge.s32.totalorder %s2022_s22, %s2028_s24 }
 0x8cc   : > { %s1678_s26 = smov (!%p971_p8), %s2022_s22  }
 0x8cd   : > { %973 = sbr.rel (%p971_p8) target bundleno = 2385 (0x951), region = 235 }
 0x8d2   : > { %v1674_v14 = vmov -1e+30  }
 0x8d3 LB: >> { %s1725_s2 = smov 127   ;;  %s616_s27 = sld [smem:[#allocation8 + %s1680_s26]]  ;;  %s1680_s26 = sphi %s1678_s26, %s612_s26   ;;  %v1676_v14 = vphi %v1674_v14, %v1675_v14  }
 0x8d4   : >> { %620 = vrot.lane.b32.xlu0 %v2031_v12, %s1725_s2  ;;  %s624_s28 = sadd.s32 128, %s1680_s26  ;;  %s612_s26 = sadd.s32 1, %s1680_s26  }
 0x8d5   : >> { %s625_s29 = sld [smem:[#allocation10 + %s624_s28]]  ;;  %p611_p9 = scmp.ge.s32.totalorder %s612_s26, %s2028_s24 }
 0x8d9   : >> { %s617_s30 = scalar_lea.vmem [#allocation2], %s616_s27 }
 0x8da   : >> { %v618_v4 = vld [vmem:[%s617_s30] sm:$0x1] }
 0x8db   : >> { %v626_v5 = vstv %s625_s29 }
 0x946   : >> { %v621_v0 = vpop.permute.xlu0 %620 }
 0x947   : >> { %v623_v1 = vadd.f32 %v621_v0, %v618_v4 }
 0x949   : >> { %v627_v15 = vadd.f32 %v626_v5, %v623_v1 }
 0x94b   : >> { %vm628_vm1 = vcmp.gt.f32.partialorder %v627_v15, 0.0  ;;  %v629_v16 = vmul.f32 0.2, %v627_v15 }
 0x94c   : > { %614 = sbr.rel (!%p611_p9) target bundleno = 2259 (0x8d3), region = 241 }
 0x94d   : >> { %v630_v17 = vsel %vm628_vm1, %v627_v15, %v629_v16 }
 0x94e   : >> { %v631_v18 = vmax.f32 %v1676_v14, %v630_v17  }
 0x950   : >> { %v1675_v14 = vmov %v631_v18   ;;  %v1683_v13 = vmov (%p611_p9), %v631_v18  }
 0x951 PF: > { %v1698_v19 = vmov 0.0   ;;  %v1702_v20 = vmov 0.0   ;;  %982 = sbr.rel (%p971_p8) target bundleno = 2645 (0xa55), region = 246  ;;  %v1684_v13 = vphi %v1682_v13, %v1683_v13  }
 0x956   : > { %v1686_v21 = vmov 0.0   ;;  %v1690_v22 = vmov 0.0  }
 0x957 LB: >> { %s1726_s3 = smov 127   ;;  %v1727_v23 = vmov 32   ;;  %s640_s13 = sld [smem:[#allocation8 + %s1696_s22]]  ;;  %s1696_s22 = sphi %s2022_s22, %s635_s22   ;;  %v1692_v22 = vphi %v1690_v22, %v1691_v22   ;;  %v1688_v21 = vphi %v1686_v21, %v1687_v21  }
 0x958   : >> { %644 = vrot.lane.b32.xlu0 %v2031_v12, %s1726_s3  ;;  %s648_s8 = sadd.s32 128, %s1696_s22  ;;  %s635_s22 = sadd.s32 1, %s1696_s22  }
 0x959   : >> { %1301 = vset.pattern.permute.xlu0 %v1727_v23  ;;  %s649_s10 = sld [smem:[#allocation10 + %s648_s8]]  ;;  %p634_p10 = scmp.ge.s32.totalorder %s635_s22, %s2028_s24 }
 0x95d   : >> { %s641_s1 = scalar_lea.vmem [#allocation2], %s640_s13 }
 0x95e   : >> { %v642_v24 = vld [vmem:[%s641_s1] sm:$0x1] }
 0x95f   : >> { %v650_v26 = vstv %s649_s10 }
 0x9ca   : >> { %v645_v25 = vpop.permute.xlu0 %644 }
 0x9cb   : >> { %v647_v27 = vadd.f32 %v645_v25, %v642_v24 }
 0x9cd   : >> { %v651_v28 = vadd.f32 %v650_v26, %v647_v27 }
 0x9cf   : >> { %vm652_vm2 = vcmp.gt.f32.partialorder %v651_v28, 0.0  ;;  %v653_v29 = vmul.f32 0.2, %v651_v28 }
 0x9d1   : >> { %v654_v30 = vsel %vm652_vm2, %v651_v28, %v653_v29 }
 0x9d2   : >> { %v655_v31 = vsub.f32 %v654_v30, %v1684_v13 }
 0x9d4   : >> { %v656_v32 = vmul.f32 1.442695, %v655_v31 }
 0x9d6   : >> { %1302 = vpow2.f32 %v656_v32 }
 0x9dc   : >> { %v1303_v33 = vpop.eup %1302 }
 0x9dd   : >> { %v658_v34 = vadd.f32 %v1692_v22, %v1303_v33   ;;  %661 = vperm.xlu0 %1301, %v1303_v33  }
 0x9df   : >> { %v1691_v22 = vmov %v658_v34   ;;  %v1703_v20 = vmov (%p634_p10), %v658_v34  }
 0xa4f   : >> { %v662_v35 = vpop.permute.xlu0 %661 }
 0xa50   : >> { %v664_v36 = vmul.f32 %v662_v35, %v642_v24  ;;  %637 = sbr.rel (!%p634_p10) target bundleno = 2391 (0x957), region = 252 }
 0xa52   : >> { %v665_v37 = vadd.f32 %v1688_v21, %v664_v36  }
 0xa54   : >> { %v1687_v21 = vmov %v665_v37   ;;  %v1699_v19 = vmov (%p634_p10), %v665_v37  }
 0xa55 PF: > { %v666_v38 = vadd.f32 1e-16, %v1704_v20  ;;  %v1728_v39 = vmov 32   ;;  %s674_s6 = scalar_lea.vmem [#allocation3], %s1672_s0  ;;  %p600_p11 = scmp.ge.s32.totalorder %s2025_s23, 16   ;;  %v1704_v20 = vphi %v1702_v20, %v1703_v20   ;;  %v1700_v19 = vphi %v1698_v19, %v1699_v19  }
 0xa56   : > { %1304 = vset.pattern.permute.xlu0 %v1728_v39  ;;  %s2120_s0 = smov %s2025_s23  ;;  %v1307_v45 = vld [vmem:[%s2110_s5 + $0x2] ss:$0 sm:$0xff] (%p600_p11)  ;;  %v772_v21 = vld [vmem:[#allocation14 + $0x68] sm:$0xff] (%p600_p11)  ;;  %v771_v22 = vld [vmem:[#allocation14 + $0x60] sm:$0xff] (%p600_p11)  ;;  %s893_s29 = sshll.u32 (%p600_p11), %s2117_s12, 4  ;;  %s894_s29 = int_to_ptr.hbm [resolvable:$true] %s893_s29 }
 0xa57   : > { %1305 = vrcp.f32 %v666_v38  ;;  %v773_v20 = vld [vmem:[#allocation14 + $0x70] sm:$0xff] (%p600_p11)  ;;  %v770_v23 = vld [vmem:[#allocation14 + $0x58] sm:$0xff] (%p600_p11)  ;;  %v768_v25 = vld [vmem:[#allocation14 + $0x48] sm:$0xff] (%p600_p11) }
 0xa58   :  { %v769_v24 = vld [vmem:[#allocation14 + $0x50] sm:$0xff] (%p600_p11)  ;;  %v767_v26 = vld [vmem:[#allocation14 + $0x40] sm:$0xff] (%p600_p11)  ;;  %v766_v28 = vld [vmem:[#allocation14 + $0x38] sm:$0xff] (%p600_p11) }
 0xa59   :  { %v765_v29 = vld [vmem:[#allocation14 + $0x30] sm:$0xff] (%p600_p11)  ;;  %v764_v30 = vld [vmem:[#allocation14 + $0x28] sm:$0xff] (%p600_p11) }
 0xa5d   : > { %v1306_v40 = vpop.eup %1305 }
 0xa5e   : > { %670 = vperm.xlu0 %1304, %v1306_v40  }
 0xacf   :  { %602 = sbr.rel (!%p600_p11) target bundleno = 2244 (0x8c4), region = 263 }
 0xad0   : > { %v671_v41 = vpop.permute.xlu0 %670 }
 0xad1   : > { %v673_v42 = vmul.f32 %v1700_v19, %v671_v41  ;;  %v774_v19 = vld [vmem:[#allocation14 + $0x78] sm:$0xff] (%p600_p11)  ;;  %v763_v41 = vld [vmem:[#allocation14 + $0x20] sm:$0xff] (%p600_p11) }
 0xad2   :  { %779 = vmatpush.msra.mxu3 (%p600_p11), %v774_v19 }
 0xad3   : > { %675 = vst [vmem:[%s674_s6] sm:$0x1] %v673_v42  ;;  %v762_v42 = vld [vmem:[#allocation14 + $0x18] sm:$0xff] (%p600_p11) }
 0xad4   :  { %780 = vmatpush.msra.mxu3 %v773_v20 }
 0xad6   :  { %781 = vmatpush.msra.mxu3 %v772_v21 }
 0xad8   :  { %782 = vmatpush.msra.mxu3 %v771_v22 }
 0xada   :  { %v676_v43 = vld [vmem:[#allocation3] sm:$0xff]  ;;  %v677_v44 = vld [vmem:[#allocation3 + $0x8] sm:$0xff]  ;;  %783 = vmatpush.msra.mxu3 %v770_v23 }
 0xadb   :  { %v683_v46 = vadd.f32 %v1307_v45, %v676_v43  ;;  %v684_v47 = vadd.f32 %v1307_v45, %v677_v44  ;;  %v761_v43 = vld [vmem:[#allocation14 + $0x10] sm:$0xff]  ;;  %v760_v44 = vld [vmem:[#allocation14 + $0x8] sm:$0xff]  ;;  %v759_v45 = vld [vmem:[#allocation14] sm:$0xff] }
 0xadc   :  { %784 = vmatpush.msra.mxu3 %v769_v24 }
 0xadd   :  { %v685_v48 = vadd.f32 %v683_v46, %v554_v7  ;;  %v686_v49 = vadd.f32 %v684_v47, %v555_v8  ;;  %v819_v46 = vld [vmem:[#allocation15 + $0x78] sm:$0xff]  ;;  %v818_v47 = vld [vmem:[#allocation15 + $0x70] sm:$0xff] }
 0xade   :  { %785 = vmatpush.msra.mxu3 %v768_v25  ;;  %824 = vmatpush.msrb.mxu0 %v819_v46 }
 0xadf   :  { %v2070_v50 = vmul.f32 %v1838_v9, %v685_v48  ;;  %v2073_v51 = vmul.f32 %v1838_v9, %v686_v49  ;;  %999 = vmatpush.msrb.mxu1 %v819_v46  ;;  %v817_v48 = vld [vmem:[#allocation15 + $0x68] sm:$0xff]  ;;  %v816_v49 = vld [vmem:[#allocation15 + $0x60] sm:$0xff] }
 0xae0   :  { %786 = vmatpush.msra.mxu3 %v767_v26  ;;  %825 = vmatpush.msrb.mxu0 %v818_v47 }
 0xae1   :  { %v689_v52 = vadd.f32 %v2073_v51, %v2070_v50  ;;  %v699_v53 = vmul.f32 %v2070_v50, %v2070_v50  ;;  %v700_v54 = vmul.f32 %v2073_v51, %v2073_v51  ;;  %1000 = vmatpush.msrb.mxu1 %v818_v47 }
 0xae2   :  { %787 = vmatpush.msra.mxu3 %v766_v28  ;;  %826 = vmatpush.msrb.mxu0 %v817_v48 }
 0xae3   :  { %690 = vadd.xlane.f32.xlu0 %v689_v52  ;;  %v701_v55 = vadd.f32 %v700_v54, %v699_v53  ;;  %1001 = vmatpush.msrb.mxu1 %v817_v48  ;;  %v815_v52 = vld [vmem:[#allocation15 + $0x58] sm:$0xff]  ;;  %v814_v53 = vld [vmem:[#allocation15 + $0x50] sm:$0xff]  ;;  %v813_v54 = vld [vmem:[#allocation15 + $0x48] sm:$0xff] }
 0xae4   :  { %788 = vmatpush.msra.mxu3 %v765_v29  ;;  %827 = vmatpush.msrb.mxu0 %v816_v49 }
 0xae5   :  { %1002 = vmatpush.msrb.mxu1 %v816_v49 }
 0xae6   :  { %789 = vmatpush.msra.mxu3 %v764_v30  ;;  %828 = vmatpush.msrb.mxu0 %v815_v52 }
 0xae7   :  { %1003 = vmatpush.msrb.mxu1 %v815_v52 }
 0xae8   :  { %790 = vmatpush.msra.mxu3 %v763_v41  ;;  %829 = vmatpush.msrb.mxu0 %v814_v53 }
 0xae9   :  { %1004 = vmatpush.msrb.mxu1 %v814_v53 }
 0xaea   :  { %791 = vmatpush.msra.mxu3 %v762_v42  ;;  %830 = vmatpush.msrb.mxu0 %v813_v54 }
 0xaeb   :  { %702 = vadd.xlane.f32.xlu0 %v701_v55  ;;  %1005 = vmatpush.msrb.mxu1 %v813_v54 }
 0xaec   :  { %792 = vmatpush.msra.mxu3 %v761_v43 }
 0xaee   :  { %793 = vmatpush.msra.mxu3 %v760_v44 }
 0xaf0   :  { %794 = vmatpush.msra.mxu3 %v759_v45 }
 0xb56   :  { %v691_v56 = vpop.xlane.xlu0 %690 }
 0xb57   :  { %v692_v57 = vrot.slane %v691_v56, 4 }
 0xb59   :  { %v693_v60 = vadd.f32 %v692_v57, %v691_v56  ;;  %v812_v56 = vld [vmem:[#allocation15 + $0x40] sm:$0xff] }
 0xb5a   :  { %831 = vmatpush.msrb.mxu0 %v812_v56  ;;  %1006 = vmatpush.msrb.mxu1 %v812_v56 }
 0xb5b   :  { %v694_v61 = vrot.slane %v693_v60, 2 }
 0xb5d   :  { %v695_v62 = vadd.f32 %v694_v61, %v693_v60  ;;  %v811_v60 = vld [vmem:[#allocation15 + $0x38] sm:$0xff] }
 0xb5e   :  { %v703_v63 = vpop.xlane.xlu0 %702  ;;  %832 = vmatpush.msrb.mxu0 %v811_v60  ;;  %1007 = vmatpush.msrb.mxu1 %v811_v60 }
 0xb5f   :  { %v704_v9 = vrot.slane %v703_v63, 4  ;;  %v696_v2 = vrot.slane %v695_v62, 1 }
 0xb61   :  { %v705_v6 = vadd.f32 %v704_v9, %v703_v63  ;;  %v697_v7 = vadd.f32 %v696_v2, %v695_v62  ;;  %v810_v9 = vld [vmem:[#allocation15 + $0x30] sm:$0xff] }
 0xb62   :  { %833 = vmatpush.msrb.mxu0 %v810_v9  ;;  %1008 = vmatpush.msrb.mxu1 %v810_v9 }
 0xb63   :  { %v706_v58 = vrot.slane %v705_v6, 2  ;;  %1031 = vpush %v697_v7  ;;  %v809_v7 = vld [vmem:[#allocation15 + $0x28] sm:$0xff] }
 0xb64   :  { %834 = vmatpush.msrb.mxu0 %v809_v7  ;;  %1009 = vmatpush.msrb.mxu1 %v809_v7 }
 0xb65   :  { %v707_v8 = vadd.f32 %v706_v58, %v705_v6 }
 0xb67   :  { %v708_v59 = vrot.slane %v707_v8, 1 }
 0xb69   :  { %v709_v11 = vadd.f32 %v708_v59, %v707_v8 }
 0xb6b   :  { %1033 = vpush %v709_v11  ;;  %v807_v11 = vld [vmem:[#allocation15 + $0x18] sm:$0xff] }
 0xb94   :  { %s1032_s5 = spop %1031 }
 0xb95   :  { %s2081_s18 = smul.f32 0.001953125, %s1032_s5 }
 0xb97   :  { %s713_s4 = smul.f32 %s2081_s18, %s2081_s18  ;;  %v716_v55 = vstv %s2081_s18 }
 0xb98   :  { %v717_v57 = vsub.f32 %v2070_v50, %v716_v55  ;;  %v718_v62 = vsub.f32 %v2073_v51, %v716_v55  ;;  %v808_v50 = vld [vmem:[#allocation15 + $0x20] sm:$0xff] }
 0xb99   :  { %835 = vmatpush.msrb.mxu0 %v808_v50  ;;  %1010 = vmatpush.msrb.mxu1 %v808_v50 }
 0xb9b   :  { %836 = vmatpush.msrb.mxu0 %v807_v11  ;;  %1011 = vmatpush.msrb.mxu1 %v807_v11 }
 0xb9c   :  { %s1034_s19 = spop %1033 }
 0xb9d   :  { %s712_s20 = smul.f32 0.001953125, %s1034_s19 }
 0xb9f   :  { %s714_s21 = ssub.f32 %s712_s20, %s713_s4 }
 0xba1   :  { %s715_s0 = smax.f32 %s1720_s14, %s714_s21 }
 0xba2   :  { %v719_v12 = vstv %s715_s0 }
 0xba3   :  { %1310 = vrsqrt.f32 %v719_v12  ;;  %vm727_vm3 = vcmp.eq.f32.partialorder %v719_v12, inf  ;;  %v730_v16 = vand.u32 2147483648, %v719_v12  ;;  %vm729_vm4 = vcmp.eq.f32.partialorder %v719_v12, 0.0 }
 0xba9   :  { %v1311_v13 = vpop.eup %1310 }
 0xbaa   :  { %v721_v14 = vmul.f32 %v1311_v13, %v719_v12 }
 0xbac   :  { %v722_v4 = vmul.f32 %v1311_v13, %v721_v14  ;;  %v805_v14 = vld [vmem:[#allocation15 + $0x8] sm:$0xff] }
 0xbae   :  { %v723_v0 = vmul.f32 0.5, %v722_v4  ;;  %v804_v4 = vld [vmem:[#allocation15] sm:$0xff] }
 0xbb0   :  { %v724_v5 = vsub.f32 1.5, %v723_v0 }
 0xbb2   :  { %v725_v1 = vmul.f32 %v1311_v13, %v724_v5  ;;  %v806_v13 = vld [vmem:[#allocation15 + $0x10] sm:$0xff] }
 0xbb3   :  { %837 = vmatpush.msrb.mxu0 %v806_v13  ;;  %1012 = vmatpush.msrb.mxu1 %v806_v13 }
 0xbb4   :  { %v726_v15 = vmul.f32 %v725_v1, %v719_v12 }
 0xbb5   :  { %838 = vmatpush.msrb.mxu0 %v805_v14  ;;  %1013 = vmatpush.msrb.mxu1 %v805_v14 }
 0xbb6   :  { %v728_v17 = vsel %vm727_vm3, %v719_v12, %v726_v15 }
 0xbb7   :  { %v731_v18 = vsel %vm729_vm4, %v730_v16, %v728_v17  ;;  %839 = vmatpush.msrb.mxu0 %v804_v4  ;;  %1014 = vmatpush.msrb.mxu1 %v804_v4  ;;  %v1309_v17 = vld [vmem:[%s2116_s11] ss:$0 sm:$0xff] }
 0xbb8   :  { %1035 = vpush %v731_v18 }
 0xbe9   :  { %s1036_s14 = spop %1035 }
 0xbea   :  { %s733_s22 = sadd.f32 1e-05, %s1036_s14 }
 0xbec   :  { %v734_v27 = vstv %s733_s22 }
 0xbed   :  { %1312 = vrcp.f32 %v734_v27  ;;  %v746_v34 = vand.u32 2147483648, %v734_v27  ;;  %v744_v36 = vand.u32 2147483647, %v734_v27  ;;  %vm740_vm6 = vweird.f32 %v734_v27 }
 0xbef   :  { %v747_v38 = vor.u32 1.1754944e-38, %v746_v34  ;;  %vm745_vm8 = vcmp.eq.f32.partialorder %v744_v36, 8.507059e+37 }
 0xbf3   :  { %v1313_v31 = vpop.eup %1312 }
 0xbf4   :  { %v736_v32 = vmul.f32 %v1313_v31, %v734_v27  ;;  %vm741_vm5 = vweird.f32 %v1313_v31 }
 0xbf5   :  { %vm742_vm7 = vmor %vm740_vm6, %vm741_vm5 }
 0xbf6   :  { %v737_v33 = vsub.f32 1.0, %v736_v32 }
 0xbf8   :  { %v738_v35 = vmul.f32 %v1313_v31, %v737_v33 }
 0xbfa   :  { %v739_v37 = vadd.f32 %v1313_v31, %v738_v35 }
 0xbfc   :  { %v743_v39 = vsel %vm742_vm7, %v1313_v31, %v739_v37 }
 0xbfd   :  { %v748_v40 = vsel %vm745_vm8, %v747_v38, %v743_v39 }
 0xbfe   :  { %1037 = vpush %v748_v40 }
 0xc2f   :  { %s1038_s23 = spop %1037 }
 0xc30   :  { %v750_v61 = vstv %s1038_s23 }
 0xc31   :  { %v751_v63 = vmul.f32 %v750_v61, %v717_v57  ;;  %v752_v2 = vmul.f32 %v750_v61, %v718_v62 }
 0xc33   :  { %v753_v6 = vmul.f32 %v751_v63, %v1909_v3  ;;  %v754_v8 = vmul.f32 %v752_v2, %v1909_v3  ;;  %v1308_v3 = vld [vmem:[%s2114_s9] ss:$0 sm:$0xff]  ;;  %s1729_s9 = smov [#allocation17]  }
 0xc34   :  { %s891_s11 = sshll.u32 %s1729_s9, 4  ;;  %s892_s11 = int_to_ptr.vmem [resolvable:$true] %s891_s11 }
 0xc35   :  { %v755_v58 = vadd.f32 %v753_v6, %v1913_v10  ;;  %v756_v51 = vadd.f32 %v754_v8, %v1913_v10 }
 0xc37   :  { %v757_v59 = vmax.f32 %v755_v58, 0.0  ;;  %v758_v12 = vmax.f32 %v756_v51, 0.0 }
 0xc39   :  { %795 = vmatmul.f32.vlgmr.msra.gmra.mxu3 %v757_v59 }
 0xc41   :  { %798 = vmatmul.f32.gmra.mxu3 %v758_v12 }
 0xcbc   :  { %v796_v0 = vpop.f32.mrf.mxu3 }
 0xcbd   :  { %v797_v5 = vadd.f32 %v1308_v3, %v796_v0 }
 0xcbf   :  { %v802_v1 = vmax.f32 %v797_v5, 0.0 }
 0xcc1   :  { %840 = vmatmul.f32.vlgmr.msrb.gmra.mxu0 %v802_v1 }
 0xcc4   :  { %v799_v10 = vpop.f32.mrf.mxu3 }
 0xcc5   :  { %v800_v15 = vadd.f32 %v1308_v3, %v799_v10 }
 0xcc7   :  { %v803_v16 = vmax.f32 %v800_v15, 0.0 }
 0xcc9   :  { %843 = vmatmul.f32.vlgmr.msrb.gmra.mxu1 %v803_v16 }
 0xd3e   :  { %v841_v18 = vpop.f32.mrf.mxu0 }
 0xd3f   :  { %v842_v19 = vadd.f32 %v1309_v17, %v841_v18 }
 0xd41   :  { %v997_v20 = vmul.f32 -1.442695, %v842_v19 }
 0xd43   :  { %1314 = vpow2.f32 %v997_v20 }
 0xd46   :  { %v844_v21 = vpop.f32.mrf.mxu1 }
 0xd47   :  { %v845_v22 = vadd.f32 %v1309_v17, %v844_v21 }
 0xd49   :  { %v1315_v23 = vpop.eup %1314  ;;  %v998_v24 = vmul.f32 -1.442695, %v845_v22 }
 0xd4a   :  { %v853_v25 = vadd.f32 1.0, %v1315_v23 }
 0xd4b   :  { %1316 = vpow2.f32 %v998_v24 }
 0xd4c   :  { %1318 = vrcp.f32 %v853_v25  ;;  %v866_v31 = vand.u32 2147483648, %v853_v25  ;;  %v864_v33 = vand.u32 2147483647, %v853_v25  ;;  %vm860_vm10 = vweird.f32 %v853_v25 }
 0xd4e   :  { %v867_v36 = vor.u32 1.1754944e-38, %v866_v31  ;;  %vm865_vm12 = vcmp.eq.f32.partialorder %v864_v33, 8.507059e+37 }
 0xd51   :  { %v1317_v26 = vpop.eup %1316 }
 0xd52   :  { %v1319_v27 = vpop.eup %1318  ;;  %v854_v28 = vadd.f32 1.0, %v1317_v26 }
 0xd53   :  { %v856_v29 = vmul.f32 %v1319_v27, %v853_v25  ;;  %vm861_vm9 = vweird.f32 %v1319_v27 }
 0xd54   :  { %1320 = vrcp.f32 %v854_v28  ;;  %vm862_vm11 = vmor %vm860_vm10, %vm861_vm9  ;;  %v881_v41 = vand.u32 2147483648, %v854_v28  ;;  %v879_v43 = vand.u32 2147483647, %v854_v28  ;;  %vm875_vm14 = vweird.f32 %v854_v28 }
 0xd55   :  { %v857_v30 = vsub.f32 1.0, %v856_v29 }
 0xd56   :  { %v882_v45 = vor.u32 1.1754944e-38, %v881_v41  ;;  %vm880_vm0 = vcmp.eq.f32.partialorder %v879_v43, 8.507059e+37 }
 0xd57   :  { %v858_v32 = vmul.f32 %v1319_v27, %v857_v30 }
 0xd59   :  { %v859_v34 = vadd.f32 %v1319_v27, %v858_v32 }
 0xd5a   :  { %v1321_v35 = vpop.eup %1320 }
 0xd5b   :  { %v863_v37 = vsel %vm862_vm11, %v1319_v27, %v859_v34  ;;  %v871_v38 = vmul.f32 %v1321_v35, %v854_v28  ;;  %vm876_vm13 = vweird.f32 %v1321_v35 }
 0xd5c   :  { %v868_v39 = vsel %vm865_vm12, %v867_v36, %v863_v37  ;;  %vm877_vm15 = vmor %vm875_vm14, %vm876_vm13 }
 0xd5d   :  { %v872_v40 = vsub.f32 1.0, %v871_v38  ;;  %885 = vst [vmem:[#allocation17] sm:$0xff] %v868_v39 }
 0xd5f   :  { %v873_v42 = vmul.f32 %v1321_v35, %v872_v40 }
 0xd61   :  { %v874_v44 = vadd.f32 %v1321_v35, %v873_v42 }
 0xd63   :  { %v878_v46 = vsel %vm877_vm15, %v1321_v35, %v874_v44 }
 0xd64   :  { %v883_v47 = vsel %vm880_vm0, %v882_v45, %v878_v46 }
 0xd65   :  { %886 = vst [vmem:[#allocation17 + $0x8] sm:$0xff] %v883_v47 }
 0xd66   :  { %899 = dma.vmem_to_hbm [thread:$0]  %s892_s11, 256, %s894_s29, [#allocation6], %s1708_s15, %s1708_s15, %s1709_s16  }
 0xd67   :  { %1596 = dma.done.wait [#allocation6], 256  }
 0xd68   :  { %1597 = vsyncadd [#allocation6], 4294967040 }
 0xd69   :  { %904 = vsyncpa [#allocation5], 1 }
 0xd6a   :  { %905 = vsyncpa [#allocation13], 1 }
 0xd6b   :  { %906 = vsyncpa [#allocation16], 1 }
 0xd6c   :  { %907 = vsyncpa [#allocation6], 1 }
 0xd6d   :  { %908 = vsyncpa [#allocation7], 1 }
 0xd6e   :  { %909 = vsyncpa [#allocation9], 1 }

</bundles_post_ra>
